<compile_context>
chip_gen: v7x
topology: tpu7x:2x2x1
jax: 0.10.0
libtpu: 0.0.40
codegen_flags: <defaults>
</compile_context>

<pallas_src>
import functools

import jax
import jax.numpy as jnp
from jax.experimental import pallas as pl
from jax.experimental.pallas import tpu as pltpu

_IN_PAD = 8      # padded input feature dim (5 real features + 1.0 bias column + zeros)
_HEAD_PAD = 128  # lane-dense fused-head / output width (col 0 = mu, col 1 = sigma)


@functools.lru_cache(maxsize=1)
def _device_profile():
    """(tile cap, dual-TensorCore?, bf16 VPU/EUP?) from the local device kind."""
    kind = jax.devices()[0].device_kind.lower()
    is_v5 = "v5" in kind
    two_tc = any(t in kind for t in ("v7", "v4", "v3"))
    cap = 512 if is_v5 else 1024
    return cap, two_tc, (not is_v5)


def _round_up(n, m):
    return -(-n // m) * m


def _silu_to_bf16(h_f32, use_bf16_act):
    """SiLU via sigmoid(x) = 0.5*(tanh(0.5x)+1) (single EUP op); returns bf16
    ready for the next MXU dot."""
    if use_bf16_act:
        hb = h_f32.astype(jnp.bfloat16)
        return hb * (0.5 * (jnp.tanh(0.5 * hb) + 1.0))
    s = h_f32 * (0.5 * (jnp.tanh(0.5 * h_f32) + 1.0))
    return s.astype(jnp.bfloat16)


def actor_kernel(x_ref,
                 w1_ref,
                 w2_ref, b2_ref,
                 w3_ref, b3_ref,
                 wh_ref, bh_ref,
                 out_ref, *, use_bf16_act):
    """Fused forward pass for one batch tile; all weights resident in VMEM."""
    x = x_ref[...].astype(jnp.bfloat16)                                  # (tb, 8)

    # Layer 1: b1 is folded into w1 (input column 5 carries 1.0), so no bias add.
    h = jnp.dot(x, w1_ref[...], preferred_element_type=jnp.float32)     # (tb, 512) f32
    h = _silu_to_bf16(h, use_bf16_act)

    h = jnp.dot(h, w2_ref[...], preferred_element_type=jnp.float32) + b2_ref[...]
    h = _silu_to_bf16(h, use_bf16_act)

    h = jnp.dot(h, w3_ref[...], preferred_element_type=jnp.float32) + b3_ref[...]
    h = _silu_to_bf16(h, use_bf16_act)                                   # (tb, 512) bf16

    # Fused heads: one lane-dense matmul. Column 0 = mu, column 1 = log_sigma,
    # remaining columns are zero padding (discarded by the wrapper).
    heads = jnp.dot(h, wh_ref[...], preferred_element_type=jnp.float32) + bh_ref[...]
    sigma_like = jnp.exp(jnp.clip(heads, -20.0, 2.0))                    # f32 epilogue
    col = jax.lax.broadcasted_iota(jnp.int32, heads.shape, 1)
    out_ref[...] = jnp.where(col == 0, heads, sigma_like).astype(out_ref.dtype)


def _pick_tile_b(batch):
    """Large tiles (grid-step overhead ~0.35us dominates small tiles); on
    dual-TC parts keep >=2 grid steps so both TensorCores get work."""
    cap, two_tc, _ = _device_profile()
    rounded = max(8, _round_up(batch, 8))
    if two_tc and batch >= 64:
        return min(cap, max(8, _round_up(-(-batch // 2), 8)))
    return min(cap, rounded)


@functools.partial(jax.jit, static_argnames=("tile_b", "use_bf16_act"))
def _actor_forward_padded(xp, packed, tile_b, use_bf16_act):
    """xp: (B_pad, 8) f32 with B_pad % tile_b == 0. Returns (B_pad, 128) f32 slab."""
    w1, w2, b2, w3, b3, wh, bh = packed
    b_pad = xp.shape[0]
    grid = (b_pad // tile_b,)

    const = lambda i: (0, 0)  # weights/biases: one constant block, resident in VMEM
    weight_specs = [pl.BlockSpec(a.shape, const) for a in (w1, w2, b2, w3, b3, wh, bh)]

    kernel = functools.partial(actor_kernel, use_bf16_act=use_bf16_act)
    return pl.pallas_call(
        kernel,
        out_shape=jax.ShapeDtypeStruct((b_pad, _HEAD_PAD), jnp.float32),
        grid=grid,
        in_specs=[pl.BlockSpec((tile_b, _IN_PAD), lambda i: (i, 0))] + weight_specs,
        out_specs=pl.BlockSpec((tile_b, _HEAD_PAD), lambda i: (i, 0)),
        compiler_params=pltpu.CompilerParams(
            dimension_semantics=("parallel",)),
    )(xp, w1, w2, b2, w3, b3, wh, bh)


def actor_forward(x, packed_params, tile_b=None):
    """x: (B, 5) float32. Returns (mu (B, 1), sigma (B, 1))."""
    B, fin = x.shape
    if tile_b is None:
        tile_b = _pick_tile_b(B)
    _, _, use_bf16_act = _device_profile()
    b_pad = _round_up(B, tile_b)

    xp = jnp.zeros((b_pad, _IN_PAD), jnp.float32)
    xp = xp.at[:B, :fin].set(x.astype(jnp.float32))
    xp = xp.at[:B, fin].set(1.0)          # bias column -> folded b1 in w1p

    out = _actor_forward_padded(xp, packed_params, tile_b=tile_b,
                                use_bf16_act=use_bf16_act)
    cols = out[:B, :2]                    # single read of the padded slab
    return cols[:, 0:1], cols[:, 1:2]


def init_params(key, in_dim=5, hidden=512):
    """PyTorch nn.Linear-style init; weights stored as (in, out) so kernel does x @ W."""
    def linear(k, fan_in, fan_out):
        kw, kb = jax.random.split(k)
        bound = 1.0 / jnp.sqrt(fan_in)
        w = jax.random.uniform(kw, (fan_in, fan_out), jnp.float32, -bound, bound)
        b = jax.random.uniform(kb, (1, fan_out), jnp.float32, -bound, bound)
        return w, b

    keys = jax.random.split(key, 5)
    return (
        linear(keys[0], in_dim, hidden),   # fc[0]
        linear(keys[1], hidden, hidden),   # fc[2]
        linear(keys[2], hidden, hidden),   # fc[4]
        linear(keys[3], hidden, 1),        # h1
        linear(keys[4], hidden, 1),        # h2
    )


def pack_params(params):
    """One-time packing: pad w1 rows + fold b1 into the bias row, fuse+lane-pad
    the two heads, bf16 matmul weights (f32 biases)."""
    (w1, b1), (w2, b2), (w3, b3), (wh1, bh1), (wh2, bh2) = params
    in_dim, hidden = w1.shape
    assert in_dim + 1 <= _IN_PAD

    w1p = (jnp.zeros((_IN_PAD, hidden), jnp.float32)
           .at[:in_dim].set(w1)
           .at[in_dim].set(b1[0]))         # folded bias row (input bias column = 1.0)
    wh = (jnp.zeros((hidden, _HEAD_PAD), jnp.float32)
          .at[:, 0:1].set(wh1).at[:, 1:2].set(wh2))
    bh = (jnp.zeros((1, _HEAD_PAD), jnp.float32)
          .at[:, 0:1].set(bh1).at[:, 1:2].set(bh2))

    bf16 = lambda w: w.astype(jnp.bfloat16)
    return (bf16(w1p),
            bf16(w2), b2.astype(jnp.float32),
            bf16(w3), b3.astype(jnp.float32),
            bf16(wh), bh.astype(jnp.float32))


def _silu(x):
    return x * jax.nn.sigmoid(x)


def actor_ref(x, params):
    """Plain-JAX reference mirroring the kernel's bf16-operand / f32-accumulate dots."""
    (w1, b1), (w2, b2), (w3, b3), (wh1, bh1), (wh2, bh2) = params

    def dot(a, w):
        return jnp.dot(a.astype(jnp.bfloat16), w.astype(jnp.bfloat16),
                       preferred_element_type=jnp.float32)

    h = _silu(dot(x, w1) + b1)
    h = _silu(dot(h, w2) + b2)
    h = _silu(dot(h, w3) + b3)
    mu = dot(h, wh1) + bh1
    sigma = jnp.exp(jnp.clip(dot(h, wh2) + bh2, -20.0, 2.0))
    return mu, sigma


def _check(mu, sigma, mu_ref, sigma_ref, B):
    assert mu.shape == (B, 1) and sigma.shape == (B, 1)
    # bf16 operands + bf16 SiLU (on v6e/v7x) + folded bf16 b1 -> ~1e-3 abs error.
    assert jnp.allclose(mu, mu_ref, atol=1e-2, rtol=1e-2)
    assert jnp.allclose(sigma, sigma_ref, atol=1e-2, rtol=1e-2)
    assert bool(jnp.all(sigma > 0))


if __name__ == "__main__":
    key = jax.random.PRNGKey(0)
    kx, kx2, kx3, kp = jax.random.split(key, 4)

    IN = 5
    params = init_params(kp, in_dim=IN, hidden=512)
    packed = pack_params(params)

    # Test 1: small batch, single grid step.
    B = 8
    x = jax.random.normal(kx, (B, IN), jnp.float32)
    mu, sigma = actor_forward(x, packed)
    jax.block_until_ready((mu, sigma))
    _check(mu, sigma, *actor_ref(x, params), B)

    # Test 2: multi-tile grid + non-divisible batch (exercises padding & index_map).
    B2 = 20
    x2 = jax.random.normal(kx2, (B2, IN), jnp.float32)
    mu2, sigma2 = actor_forward(x2, packed, tile_b=8)   # grid = (3,) with padding
    jax.block_until_ready((mu2, sigma2))
    _check(mu2, sigma2, *actor_ref(x2, params), B2)

    # Test 3: larger batch through the automatic tile picker (dual-TC parts
    # split into >=2 grid steps; single-TC parts take one big tile).
    B3 = 300
    x3 = jax.random.normal(kx3, (B3, IN), jnp.float32)
    mu3, sigma3 = actor_forward(x3, packed)
    jax.block_until_ready((mu3, sigma3))
    _check(mu3, sigma3, *actor_ref(x3, params), B3)

    print("KERNEL_OK")
</pallas_src>

<mosaic_0001>
module attributes {stable_mosaic.version = 11 : i64} {
  func.func @actor_kernel(%arg0: i32, %arg1: memref<8x8xf32, #tpu.memory_space<vmem>>, %arg2: memref<8x512xbf16, #tpu.memory_space<vmem>>, %arg3: memref<512x512xbf16, #tpu.memory_space<vmem>>, %arg4: memref<1x512xf32, #tpu.memory_space<vmem>>, %arg5: memref<512x512xbf16, #tpu.memory_space<vmem>>, %arg6: memref<1x512xf32, #tpu.memory_space<vmem>>, %arg7: memref<512x128xbf16, #tpu.memory_space<vmem>>, %arg8: memref<1x128xf32, #tpu.memory_space<vmem>>, %arg9: memref<8x128xf32, #tpu.memory_space<vmem>>) attributes {dimension_semantics = [#tpu.dimension_semantics<parallel>], iteration_bounds = array<i64: 1>, scalar_prefetch = 0 : i64, scratch_operands = 0 : i64, tpu.core_type = #tpu.core_type<tc>, window_params = [{transform_indices = @transform_0, window_bounds = array<i64: 8, 8>}, {pipeline_mode = #tpu.pipeline_mode<synchronous>, transform_indices = @transform_1, window_bounds = array<i64: 8, 512>}, {pipeline_mode = #tpu.pipeline_mode<synchronous>, transform_indices = @transform_2, window_bounds = array<i64: 512, 512>}, {pipeline_mode = #tpu.pipeline_mode<synchronous>, transform_indices = @transform_3, window_bounds = array<i64: 1, 512>}, {pipeline_mode = #tpu.pipeline_mode<synchronous>, transform_indices = @transform_4, window_bounds = array<i64: 512, 512>}, {pipeline_mode = #tpu.pipeline_mode<synchronous>, transform_indices = @transform_5, window_bounds = array<i64: 1, 512>}, {pipeline_mode = #tpu.pipeline_mode<synchronous>, transform_indices = @transform_6, window_bounds = array<i64: 512, 128>}, {pipeline_mode = #tpu.pipeline_mode<synchronous>, transform_indices = @transform_7, window_bounds = array<i64: 1, 128>}, {transform_indices = @transform_8, window_bounds = array<i64: 8, 128>}]} {
    %c0 = arith.constant 0 : index
    %c0_0 = arith.constant 0 : index
    %0 = vector.load %arg1[%c0, %c0_0] : memref<8x8xf32, #tpu.memory_space<vmem>>, vector<8x8xf32>
    %1 = arith.truncf %0 : vector<8x8xf32> to vector<8x8xbf16>
    %c0_1 = arith.constant 0 : index
    %c0_2 = arith.constant 0 : index
    %2 = vector.load %arg2[%c0_1, %c0_2] : memref<8x512xbf16, #tpu.memory_space<vmem>>, vector<8x512xbf16>
    %cst = arith.constant dense<0.000000e+00> : vector<8x512xf32>
    %3 = tpu.matmul %1, %2, %cst {dimension_numbers = #tpu.dot_dimension_numbers<[1], [0], [0], [1], [0, 0, 1, 1], [], []>} : vector<8x8xbf16>, vector<8x512xbf16>, vector<8x512xf32> -> vector<8x512xf32>
    %4 = arith.truncf %3 : vector<8x512xf32> to vector<8x512xbf16>
    %cst_3 = arith.constant 5.000000e-01 : bf16
    %5 = vector.broadcast %cst_3 : bf16 to vector<8x512xbf16>
    %6 = arith.mulf %5, %4 : vector<8x512xbf16>
    %7 = math.tanh %6 : vector<8x512xbf16>
    %cst_4 = arith.constant 1.000000e+00 : bf16
    %8 = vector.broadcast %cst_4 : bf16 to vector<8x512xbf16>
    %9 = arith.addf %7, %8 : vector<8x512xbf16>
    %cst_5 = arith.constant 5.000000e-01 : bf16
    %10 = vector.broadcast %cst_5 : bf16 to vector<8x512xbf16>
    %11 = arith.mulf %10, %9 : vector<8x512xbf16>
    %12 = arith.mulf %4, %11 : vector<8x512xbf16>
    %c0_6 = arith.constant 0 : index
    %c0_7 = arith.constant 0 : index
    %13 = vector.load %arg3[%c0_6, %c0_7] : memref<512x512xbf16, #tpu.memory_space<vmem>>, vector<512x512xbf16>
    %cst_8 = arith.constant dense<0.000000e+00> : vector<8x512xf32>
    %14 = tpu.matmul %12, %13, %cst_8 {dimension_numbers = #tpu.dot_dimension_numbers<[1], [0], [0], [1], [0, 0, 1, 1], [], []>} : vector<8x512xbf16>, vector<512x512xbf16>, vector<8x512xf32> -> vector<8x512xf32>
    %c0_9 = arith.constant 0 : index
    %c0_10 = arith.constant 0 : index
    %15 = vector.load %arg4[%c0_9, %c0_10] : memref<1x512xf32, #tpu.memory_space<vmem>>, vector<1x512xf32>
    %16 = vector.broadcast %15 : vector<1x512xf32> to vector<8x512xf32>
    %17 = arith.addf %14, %16 : vector<8x512xf32>
    %18 = arith.truncf %17 : vector<8x512xf32> to vector<8x512xbf16>
    %cst_11 = arith.constant 5.000000e-01 : bf16
    %19 = vector.broadcast %cst_11 : bf16 to vector<8x512xbf16>
    %20 = arith.mulf %19, %18 : vector<8x512xbf16>
    %21 = math.tanh %20 : vector<8x512xbf16>
    %cst_12 = arith.constant 1.000000e+00 : bf16
    %22 = vector.broadcast %cst_12 : bf16 to vector<8x512xbf16>
    %23 = arith.addf %21, %22 : vector<8x512xbf16>
    %cst_13 = arith.constant 5.000000e-01 : bf16
    %24 = vector.broadcast %cst_13 : bf16 to vector<8x512xbf16>
    %25 = arith.mulf %24, %23 : vector<8x512xbf16>
    %26 = arith.mulf %18, %25 : vector<8x512xbf16>
    %c0_14 = arith.constant 0 : index
    %c0_15 = arith.constant 0 : index
    %27 = vector.load %arg5[%c0_14, %c0_15] : memref<512x512xbf16, #tpu.memory_space<vmem>>, vector<512x512xbf16>
    %cst_16 = arith.constant dense<0.000000e+00> : vector<8x512xf32>
    %28 = tpu.matmul %26, %27, %cst_16 {dimension_numbers = #tpu.dot_dimension_numbers<[1], [0], [0], [1], [0, 0, 1, 1], [], []>} : vector<8x512xbf16>, vector<512x512xbf16>, vector<8x512xf32> -> vector<8x512xf32>
    %c0_17 = arith.constant 0 : index
    %c0_18 = arith.constant 0 : index
    %29 = vector.load %arg6[%c0_17, %c0_18] : memref<1x512xf32, #tpu.memory_space<vmem>>, vector<1x512xf32>
    %30 = vector.broadcast %29 : vector<1x512xf32> to vector<8x512xf32>
    %31 = arith.addf %28, %30 : vector<8x512xf32>
    %32 = arith.truncf %31 : vector<8x512xf32> to vector<8x512xbf16>
    %cst_19 = arith.constant 5.000000e-01 : bf16
    %33 = vector.broadcast %cst_19 : bf16 to vector<8x512xbf16>
    %34 = arith.mulf %33, %32 : vector<8x512xbf16>
    %35 = math.tanh %34 : vector<8x512xbf16>
    %cst_20 = arith.constant 1.000000e+00 : bf16
    %36 = vector.broadcast %cst_20 : bf16 to vector<8x512xbf16>
    %37 = arith.addf %35, %36 : vector<8x512xbf16>
    %cst_21 = arith.constant 5.000000e-01 : bf16
    %38 = vector.broadcast %cst_21 : bf16 to vector<8x512xbf16>
    %39 = arith.mulf %38, %37 : vector<8x512xbf16>
    %40 = arith.mulf %32, %39 : vector<8x512xbf16>
    %c0_22 = arith.constant 0 : index
    %c0_23 = arith.constant 0 : index
    %41 = vector.load %arg7[%c0_22, %c0_23] : memref<512x128xbf16, #tpu.memory_space<vmem>>, vector<512x128xbf16>
    %cst_24 = arith.constant dense<0.000000e+00> : vector<8x128xf32>
    %42 = tpu.matmul %40, %41, %cst_24 {dimension_numbers = #tpu.dot_dimension_numbers<[1], [0], [0], [1], [0, 0, 1, 1], [], []>} : vector<8x512xbf16>, vector<512x128xbf16>, vector<8x128xf32> -> vector<8x128xf32>
    %c0_25 = arith.constant 0 : index
    %c0_26 = arith.constant 0 : index
    %43 = vector.load %arg8[%c0_25, %c0_26] : memref<1x128xf32, #tpu.memory_space<vmem>>, vector<1x128xf32>
    %44 = vector.broadcast %43 : vector<1x128xf32> to vector<8x128xf32>
    %45 = arith.addf %42, %44 : vector<8x128xf32>
    %cst_27 = arith.constant -2.000000e+01 : f32
    %cst_28 = arith.constant 2.000000e+00 : f32
    %46 = vector.broadcast %cst_27 : f32 to vector<8x128xf32>
    %47 = arith.maximumf %46, %45 : vector<8x128xf32>
    %48 = vector.broadcast %cst_28 : f32 to vector<8x128xf32>
    %49 = arith.minimumf %48, %47 : vector<8x128xf32>
    %50 = math.exp %49 : vector<8x128xf32>
    %51 = tpu.iota {dimensions = array<i32: 1>} : vector<8x128xi32>
    %c0_i32 = arith.constant 0 : i32
    %52 = vector.broadcast %c0_i32 : i32 to vector<8x128xi32>
    %53 = arith.cmpi eq, %51, %52 : vector<8x128xi32>
    %54 = arith.select %53, %45, %50 : vector<8x128xi1>, vector<8x128xf32>
    %c0_29 = arith.constant 0 : index
    %c0_30 = arith.constant 0 : index
    %55 = vector.load %arg9[%c0_29, %c0_30] : memref<8x128xf32, #tpu.memory_space<vmem>>, vector<8x128xf32>
    tpu.vector_store %arg9[%c0_29, %c0_30], %54 {strides = array<i32>} : memref<8x128xf32, #tpu.memory_space<vmem>>, vector<8x128xf32>,
    return
  }
  func.func @transform_0(%arg0: i32) -> (i32, i32) {
    %c0_i32 = arith.constant 0 : i32
    %c0_i32_0 = arith.constant 0 : i32
    return %arg0, %c0_i32 : i32, i32
  }
  func.func @transform_1(%arg0: i32) -> (i32, i32) {
    %c0_i32 = arith.constant 0 : i32
    %c0_i32_0 = arith.constant 0 : i32
    %c0_i32_1 = arith.constant 0 : i32
    return %c0_i32, %c0_i32_0 : i32, i32
  }
  func.func @transform_2(%arg0: i32) -> (i32, i32) {
    %c0_i32 = arith.constant 0 : i32
    %c0_i32_0 = arith.constant 0 : i32
    %c0_i32_1 = arith.constant 0 : i32
    return %c0_i32, %c0_i32_0 : i32, i32
  }
  func.func @transform_3(%arg0: i32) -> (i32, i32) {
    %c0_i32 = arith.constant 0 : i32
    %c0_i32_0 = arith.constant 0 : i32
    %c0_i32_1 = arith.constant 0 : i32
    return %c0_i32, %c0_i32_0 : i32, i32
  }
  func.func @transform_4(%arg0: i32) -> (i32, i32) {
    %c0_i32 = arith.constant 0 : i32
    %c0_i32_0 = arith.constant 0 : i32
    %c0_i32_1 = arith.constant 0 : i32
    return %c0_i32, %c0_i32_0 : i32, i32
  }
  func.func @transform_5(%arg0: i32) -> (i32, i32) {
    %c0_i32 = arith.constant 0 : i32
    %c0_i32_0 = arith.constant 0 : i32
    %c0_i32_1 = arith.constant 0 : i32
    return %c0_i32, %c0_i32_0 : i32, i32
  }
  func.func @transform_6(%arg0: i32) -> (i32, i32) {
    %c0_i32 = arith.constant 0 : i32
    %c0_i32_0 = arith.constant 0 : i32
    %c0_i32_1 = arith.constant 0 : i32
    return %c0_i32, %c0_i32_0 : i32, i32
  }
  func.func @transform_7(%arg0: i32) -> (i32, i32) {
    %c0_i32 = arith.constant 0 : i32
    %c0_i32_0 = arith.constant 0 : i32
    %c0_i32_1 = arith.constant 0 : i32
    return %c0_i32, %c0_i32_0 : i32, i32
  }
  func.func @transform_8(%arg0: i32) -> (i32, i32) {
    %c0_i32 = arith.constant 0 : i32
    %c0_i32_0 = arith.constant 0 : i32
    return %arg0, %c0_i32 : i32, i32
  }
}

</mosaic_0001>

<bundles_post_ra>
// kernel: _actor_forward_padded.1
= control target key start
LH: loop header
LB: loop body
LE: loop exit
PB: predicated region body
PF: predicated region fallthrough
CT: control target
= control target key end

     0   :  { %13 = vsyncpa [#allocation3], 0  ;;  %s3709_s0 = inlined_call_operand.hbm [shape: f32[8,8], index: 0, kind: input, shape index: {}]   ;;  %s3710_s1 = inlined_call_operand.hbm [shape: bf16[8,512], index: 1, kind: input, shape index: {}]   ;;  %s3711_s2 = inlined_call_operand.hbm [shape: bf16[512,512], index: 2, kind: input, shape index: {}]   ;;  %s3712_s3 = inlined_call_operand.vmem [shape: f32[1,512], index: 3, kind: input, shape index: {}]   ;;  %s3713_s4 = inlined_call_operand.hbm [shape: bf16[512,512], index: 4, kind: input, shape index: {}]   ;;  %s3714_s5 = inlined_call_operand.vmem [shape: f32[1,512], index: 5, kind: input, shape index: {}]   ;;  %s3715_s6 = inlined_call_operand.hbm [shape: bf16[512,128], index: 6, kind: input, shape index: {}]   ;;  %s3716_s7 = inlined_call_operand.vmem [shape: f32[1,128], index: 7, kind: input, shape index: {}]   ;;  %s3717_s8 = inlined_call_operand.hbm [shape: f32[8,128], index: 8, kind: output, shape index: {}]  }
   0x1   :  { %14 = vsyncpa [#allocation6], 0 }
   0x2   :  { %15 = vsyncpa [#allocation9], 0 }
   0x3   :  { %16 = vsyncpa [#allocation4], 0  ;;  %s3521_s27 = smov [#allocation5]   ;;  %s3381_s9 = scalar_lea.hbm %s3710_s1, 256 }
   0x4   :  { %s33_s28 = sshll.u32 %s3521_s27, 4  ;;  %p3382_p0 = scmp.ne.s32.totalorder %s3710_s1, %s3381_s9  ;;  %s34_s28 = int_to_ptr.vmem [resolvable:$true] %s33_s28 }
   0x5   :  { %p3385_p1 = scmp.lt.u32.totalorder %s3381_s9, %s3710_s1 }
   0x7   :  { %p3387_p2 = pnand %p3385_p1, %p3382_p0 }
   0x9   :  { %3390 = shalt.err (!%p3387_p2)
}
   0xa   :  { %s3391_s14 = scalar_lea.vmem %s34_s28, 256  ;;  %p3396_p4 = scmp.lt.s32.totalorder %s34_s28, %s34_s28 }
   0xb   :  { %p3392_p3 = scmp.ne.s32.totalorder %s34_s28, %s3391_s14  ;;  %p3397_p5 = scmp.lt.s32.totalorder %s3391_s14, %s3391_s14 }
   0xd   :  { %p3398_p6 = por %p3397_p5, %p3396_p4 }
   0xf   :  { %p3399_p7 = pnand %p3398_p6, %p3392_p3 }
  0x11   :  { %3402 = shalt.err (!%p3399_p7)
}
  0x12   :  { %36 = dma.hbm_to_vmem [thread:$0]  %s3710_s1, 256, %s34_s28, [#allocation6]  }
  0x13   :  { %s3522_s17 = smov [#allocation8]   ;;  %s3523_s19 = smov [#allocation2]  }
  0x14   :  { %s56_s18 = sshll.u32 %s3522_s17, 4  ;;  %s23_s20 = sshll.u32 %s3523_s19, 4  ;;  %s57_s18 = int_to_ptr.vmem [resolvable:$true] %s56_s18  ;;  %s24_s20 = int_to_ptr.vmem [resolvable:$true] %s23_s20 }
  0x15   :  { %s3403_s23 = scalar_lea.hbm %s3713_s4, 16384 }
  0x16   :  { %p3404_p8 = scmp.ne.s32.totalorder %s3713_s4, %s3403_s23  ;;  %p3407_p9 = scmp.lt.u32.totalorder %s3403_s23, %s3713_s4 }
  0x18   :  { %p3409_p10 = pnand %p3407_p9, %p3404_p8 }
  0x1a   :  { %3412 = shalt.err (!%p3409_p10)
}
  0x1b   :  { %s3413_s1 = scalar_lea.vmem %s57_s18, 16384  ;;  %p3418_p12 = scmp.lt.s32.totalorder %s57_s18, %s57_s18 }
  0x1c   :  { %p3414_p11 = scmp.ne.s32.totalorder %s57_s18, %s3413_s1  ;;  %p3419_p13 = scmp.lt.s32.totalorder %s3413_s1, %s3413_s1 }
  0x1e   :  { %p3420_p0 = por %p3419_p13, %p3418_p12 }
  0x20   :  { %p3421_p1 = pnand %p3420_p0, %p3414_p11 }
  0x22   :  { %3424 = shalt.err (!%p3421_p1)
}
  0x23   :  { %s3524_s28 = smov 256   ;;  %s3525_s29 = smov 16  }
  0x24   :  { %62 = dma.hbm_to_vmem [thread:$0]  %s3713_s4, 16384, %s57_s18, [#allocation9], %s3524_s28, %s3524_s28, %s3525_s29  }
  0x25   :  { %s3425_s12 = scalar_lea.hbm %s3709_s0, 128 }
  0x26   :  { %p3426_p2 = scmp.ne.s32.totalorder %s3709_s0, %s3425_s12  ;;  %p3429_p3 = scmp.lt.u32.totalorder %s3425_s12, %s3709_s0 }
  0x28   :  { %p3431_p4 = pnand %p3429_p3, %p3426_p2 }
  0x2a   :  { %3434 = shalt.err (!%p3431_p4)
}
  0x2b   :  { %s3435_s17 = scalar_lea.vmem %s24_s20, 128  ;;  %p3440_p6 = scmp.lt.s32.totalorder %s24_s20, %s24_s20 }
  0x2c   :  { %p3436_p5 = scmp.ne.s32.totalorder %s24_s20, %s3435_s17  ;;  %p3441_p7 = scmp.lt.s32.totalorder %s3435_s17, %s3435_s17 }
  0x2e   :  { %p3442_p8 = por %p3441_p7, %p3440_p6 }
  0x30   :  { %p3443_p9 = pnand %p3442_p8, %p3436_p5 }
  0x32   :  { %3446 = shalt.err (!%p3443_p9)
}
  0x33   :  { %26 = dma.hbm_to_vmem [thread:$0]  %s3709_s0, 128, %s24_s20, [#allocation3]  }
  0x34   :  { %s3526_s19 = smov [#allocation7]   ;;  %s3527_s22 = smov [#allocation10]  }
  0x35   :  { %s42_s21 = sshll.u32 %s3526_s19, 4  ;;  %s70_s23 = sshll.u32 %s3527_s22, 4  ;;  %s43_s21 = int_to_ptr.vmem [resolvable:$true] %s42_s21  ;;  %s71_s23 = int_to_ptr.vmem [resolvable:$true] %s70_s23 }
  0x36   :  { %s3447_s26 = scalar_lea.hbm %s3711_s2, 16384 }
  0x37   :  { %p3448_p10 = scmp.ne.s32.totalorder %s3711_s2, %s3447_s26  ;;  %p3451_p11 = scmp.lt.u32.totalorder %s3447_s26, %s3711_s2 }
  0x39   :  { %p3453_p12 = pnand %p3451_p11, %p3448_p10 }
  0x3b   :  { %3456 = shalt.err (!%p3453_p12)
}
  0x3c   :  { %s3457_s0 = scalar_lea.vmem %s43_s21, 16384  ;;  %p3462_p0 = scmp.lt.s32.totalorder %s43_s21, %s43_s21 }
  0x3d   :  { %p3458_p13 = scmp.ne.s32.totalorder %s43_s21, %s3457_s0  ;;  %p3463_p1 = scmp.lt.s32.totalorder %s3457_s0, %s3457_s0 }
  0x3f   :  { %p3464_p2 = por %p3463_p1, %p3462_p0 }
  0x41   :  { %p3465_p3 = pnand %p3464_p2, %p3458_p13 }
  0x43   :  { %3468 = shalt.err (!%p3465_p3)
}
  0x44   :  { %48 = dma.hbm_to_vmem [thread:$0]  %s3711_s2, 16384, %s43_s21, [#allocation6], %s3524_s28, %s3524_s28, %s3525_s29  }
  0x45   :  { %s3469_s13 = scalar_lea.hbm %s3715_s6, 4096 }
  0x46   :  { %p3470_p4 = scmp.ne.s32.totalorder %s3715_s6, %s3469_s13  ;;  %p3473_p5 = scmp.lt.u32.totalorder %s3469_s13, %s3715_s6 }
  0x48   :  { %p3475_p6 = pnand %p3473_p5, %p3470_p4 }
  0x4a   :  { %3478 = shalt.err (!%p3475_p6)
}
  0x4b   :  { %s3479_s4 = scalar_lea.vmem %s71_s23, 4096  ;;  %p3484_p8 = scmp.lt.s32.totalorder %s71_s23, %s71_s23 }
  0x4c   :  { %p3480_p7 = scmp.ne.s32.totalorder %s71_s23, %s3479_s4  ;;  %p3485_p9 = scmp.lt.s32.totalorder %s3479_s4, %s3479_s4 }
  0x4e   :  { %p3486_p10 = por %p3485_p9, %p3484_p8 }
  0x50   :  { %p3487_p11 = pnand %p3486_p10, %p3480_p7 }
  0x52   :  { %3490 = shalt.err (!%p3487_p11)
}
  0x53   :  { %s3528_s2 = smov 64   ;;  %s3529_s28 = smov 4  }
  0x54   :  { %76 = dma.hbm_to_vmem [thread:$0]  %s3715_s6, 4096, %s71_s23, [#allocation9], %s3528_s2, %s3528_s2, %s3529_s28  }
  0x55   :  { %3513 = dma.done.wait [#allocation3], 128  }
  0x56   :  { %3514 = vsyncadd [#allocation3], 4294967168 }
  0x57   :  { %3515 = dma.done.wait [#allocation6], 16640  }
  0x58   :  { %3516 = vsyncadd [#allocation6], 4294950656 }
  0x59   :  { %3517 = dma.done.wait [#allocation9], 20480  }
  0x5a   :  { %3518 = vsyncadd [#allocation9], 4294946816  ;;  %v3530_v0 = vmov 0   ;;  %v99_v1 = vld [vmem:[#allocation5] sm:$0xff]  ;;  %vm115_vm0 = vcmask 1043456   ;;  %v97_v2 = vld [vmem:[#allocation2] sm:$0xff] }
  0x5b   :  { %160 = vmatprep.mubr.bf16.mxu0 %v3530_v0  ;;  %201 = vmatprep.mubr.bf16.mxu1 %v3530_v0  ;;  %v100_v3 = vld [vmem:[#allocation5 + $0x8] sm:$0xff]  ;;  %v2560_v4 = vcombine.high %v99_v1, %v99_v1  ;;  %v2559_v5 = vcombine.low %v99_v1, %v99_v1  ;;  %v2941_v8 = vld [vmem:[#allocation7 + $0x4] ss:$16 sps:$4 sm:$0xff]   ;;  %v98_v10 = vpack.c.bf16 %v97_v2, %v97_v2  ;;  %vm111_vm1 = vcmask 64512   ;;  %v2939_v13 = vld [vmem:[#allocation7] ss:$16 sps:$4 sm:$0xff]  }
  0x5c   :  { %v2562_v6 = vcombine.high %v100_v3, %v100_v3  ;;  %v2561_v7 = vcombine.low %v100_v3, %v100_v3  ;;  %v2944_v11 = vld [vmem:[#allocation7 + $0xc] ss:$16 sps:$4 sm:$0xff]   ;;  %v2942_v14 = vld [vmem:[#allocation7 + $0x8] ss:$16 sps:$4 sm:$0xff]   ;;  %v2947_v15 = vld [vmem:[#allocation7 + $0x24] ss:$16 sps:$4 sm:$0xff]  }
  0x5d   :  { %2563 = vmatprep.subr.msk.bf16.mxu0 %vm115_vm0, %v2560_v4  ;;  %v117_v9 = vsel %vm115_vm0, %v2559_v5, 0  ;;  %v2950_v16 = vld [vmem:[#allocation7 + $0x2c] ss:$16 sps:$4 sm:$0xff]   ;;  %v2945_v17 = vld [vmem:[#allocation7 + $0x20] ss:$16 sps:$4 sm:$0xff]   ;;  %s3531_s23 = smov [#allocation11]  }
  0x5e   :  { %2565 = vmatprep.subr.msk.bf16.mxu1 %vm115_vm0, %v2562_v6  ;;  %129 = vmatpush1.bf16.msra.mxu0 %v117_v9  ;;  %v123_v12 = vsel %vm115_vm0, %v2561_v7, 0  ;;  %v2948_v18 = vld [vmem:[#allocation7 + $0x28] ss:$16 sps:$4 sm:$0xff]   ;;  %v2953_v19 = vld [vmem:[#allocation7 + $0x44] ss:$16 sps:$4 sm:$0xff]   ;;  %s2548_s24 = sshll.u32 %s3531_s23, 4  ;;  %s2549_s24 = int_to_ptr.vmem [resolvable:$true] %s2548_s24 }
  0x5f   :  { %170 = vmatpush1.bf16.msra.mxu1 %v123_v12  ;;  %1024 = vmatprep.subr.bf16.mxu0 %v2941_v8  ;;  %v2956_v20 = vld [vmem:[#allocation7 + $0x4c] ss:$16 sps:$4 sm:$0xff]   ;;  %v2951_v21 = vld [vmem:[#allocation7 + $0x40] ss:$16 sps:$4 sm:$0xff]   ;;  %v2954_v22 = vld [vmem:[#allocation7 + $0x48] ss:$16 sps:$4 sm:$0xff]   ;;  %p3496_p13 = scmp.lt.s32.totalorder %s2549_s24, %s2549_s24 }
  0x60   :  { %1106 = vmatprep.subr.bf16.mxu1 %v2944_v11  ;;  %v2959_v23 = vld [vmem:[#allocation7 + $0x64] ss:$16 sps:$4 sm:$0xff]   ;;  %v2962_v24 = vld [vmem:[#allocation7 + $0x6c] ss:$16 sps:$4 sm:$0xff]   ;;  %v2957_v25 = vld [vmem:[#allocation7 + $0x60] ss:$16 sps:$4 sm:$0xff]  }
  0x61   :  { %2564 = vmatmul.mubr.msk.bf16.vlgmr.msra.gmra.mrb[0].mxu0 %vm111_vm1, %v98_v10  ;;  %v2960_v26 = vld [vmem:[#allocation7 + $0x68] ss:$16 sps:$4 sm:$0xff]   ;;  %v2965_v27 = vld [vmem:[#allocation7 + $0x84] ss:$16 sps:$4 sm:$0xff]   ;;  %v2968_v28 = vld [vmem:[#allocation7 + $0x8c] ss:$16 sps:$4 sm:$0xff]  }
  0x62   :  { %2566 = vmatmul.mubr.msk.bf16.vlgmr.msra.gmra.mrb[0].mxu1 %vm111_vm1, %v98_v10  ;;  %1025 = vmatpush1.bf16.msra.mxu0 %v2939_v13  ;;  %v2963_v29 = vld [vmem:[#allocation7 + $0x80] ss:$16 sps:$4 sm:$0xff]   ;;  %v2966_v30 = vld [vmem:[#allocation7 + $0x88] ss:$16 sps:$4 sm:$0xff]   ;;  %v2971_v31 = vld [vmem:[#allocation7 + $0xa4] ss:$16 sps:$4 sm:$0xff]  }
  0x63   :  { %1107 = vmatpush1.bf16.msra.mxu1 %v2942_v14  ;;  %1026 = vmatprep.subr.bf16.mxu0 %v2947_v15  ;;  %v2974_v32 = vld [vmem:[#allocation7 + $0xac] ss:$16 sps:$4 sm:$0xff]   ;;  %v2969_v33 = vld [vmem:[#allocation7 + $0xa0] ss:$16 sps:$4 sm:$0xff]   ;;  %v2972_v34 = vld [vmem:[#allocation7 + $0xa8] ss:$16 sps:$4 sm:$0xff]  }
  0x64   :  { %1108 = vmatprep.subr.bf16.mxu1 %v2950_v16  ;;  %v2977_v35 = vld [vmem:[#allocation7 + $0xc4] ss:$16 sps:$4 sm:$0xff]   ;;  %v2975_v36 = vld [vmem:[#allocation7 + $0xc0] ss:$16 sps:$4 sm:$0xff]   ;;  %v2980_v37 = vld [vmem:[#allocation7 + $0xcc] ss:$16 sps:$4 sm:$0xff]  }
  0x65   :  { %v2978_v38 = vld [vmem:[#allocation7 + $0xc8] ss:$16 sps:$4 sm:$0xff]   ;;  %v2983_v39 = vld [vmem:[#allocation7 + $0xe4] ss:$16 sps:$4 sm:$0xff]   ;;  %v2986_v40 = vld [vmem:[#allocation7 + $0xec] ss:$16 sps:$4 sm:$0xff]  }
  0x66   :  { %1027 = vmatpush1.bf16.msra.mxu0 %v2945_v17  ;;  %v2981_v41 = vld [vmem:[#allocation7 + $0xe0] ss:$16 sps:$4 sm:$0xff]   ;;  %v2984_v42 = vld [vmem:[#allocation7 + $0xe8] ss:$16 sps:$4 sm:$0xff]   ;;  %v2989_v43 = vld [vmem:[#allocation7 + $0x104] ss:$16 sps:$4 sm:$0xff]  }
  0x67   :  { %1109 = vmatpush1.bf16.msra.mxu1 %v2948_v18  ;;  %1028 = vmatprep.subr.bf16.mxu0 %v2953_v19  ;;  %v2992_v44 = vld [vmem:[#allocation7 + $0x10c] ss:$16 sps:$4 sm:$0xff]   ;;  %v2987_v45 = vld [vmem:[#allocation7 + $0x100] ss:$16 sps:$4 sm:$0xff]   ;;  %v2990_v46 = vld [vmem:[#allocation7 + $0x108] ss:$16 sps:$4 sm:$0xff]  }
  0x68   :  { %1110 = vmatprep.subr.bf16.mxu1 %v2956_v20  ;;  %v2995_v47 = vld [vmem:[#allocation7 + $0x124] ss:$16 sps:$4 sm:$0xff]   ;;  %v2998_v48 = vld [vmem:[#allocation7 + $0x12c] ss:$16 sps:$4 sm:$0xff]   ;;  %v2993_v49 = vld [vmem:[#allocation7 + $0x120] ss:$16 sps:$4 sm:$0xff]  }
  0x69   :  { %v2996_v50 = vld [vmem:[#allocation7 + $0x128] ss:$16 sps:$4 sm:$0xff]   ;;  %v3001_v51 = vld [vmem:[#allocation7 + $0x144] ss:$16 sps:$4 sm:$0xff]   ;;  %v3004_v52 = vld [vmem:[#allocation7 + $0x14c] ss:$16 sps:$4 sm:$0xff]  }
  0x6a   :  { %1029 = vmatpush1.bf16.msra.mxu0 %v2951_v21  ;;  %v2999_v53 = vld [vmem:[#allocation7 + $0x140] ss:$16 sps:$4 sm:$0xff]   ;;  %v3002_v54 = vld [vmem:[#allocation7 + $0x148] ss:$16 sps:$4 sm:$0xff]   ;;  %v3007_v55 = vld [vmem:[#allocation7 + $0x164] ss:$16 sps:$4 sm:$0xff]  }
  0x6b   :  { %1111 = vmatpush1.bf16.msra.mxu1 %v2954_v22  ;;  %1030 = vmatprep.subr.bf16.mxu0 %v2959_v23  ;;  %v3010_v56 = vld [vmem:[#allocation7 + $0x16c] ss:$16 sps:$4 sm:$0xff]   ;;  %v3005_v57 = vld [vmem:[#allocation7 + $0x160] ss:$16 sps:$4 sm:$0xff]   ;;  %v3008_v58 = vld [vmem:[#allocation7 + $0x168] ss:$16 sps:$4 sm:$0xff]  }
  0x6c   :  { %1112 = vmatprep.subr.bf16.mxu1 %v2962_v24  ;;  %v3013_v59 = vld [vmem:[#allocation7 + $0x184] ss:$16 sps:$4 sm:$0xff]   ;;  %v3016_v60 = vld [vmem:[#allocation7 + $0x18c] ss:$16 sps:$4 sm:$0xff]   ;;  %v3011_v61 = vld [vmem:[#allocation7 + $0x180] ss:$16 sps:$4 sm:$0xff]  }
  0x6d   :  { %v3014_v62 = vld [vmem:[#allocation7 + $0x188] ss:$16 sps:$4 sm:$0xff]   ;;  %v3019_v63 = vld [vmem:[#allocation7 + $0x1a4] ss:$16 sps:$4 sm:$0xff]   ;;  %v3022_v0 = vld [vmem:[#allocation7 + $0x1ac] ss:$16 sps:$4 sm:$0xff]  }
  0x6e   :  { %1031 = vmatpush1.bf16.msra.mxu0 %v2957_v25  ;;  %v3017_v1 = vld [vmem:[#allocation7 + $0x1a0] ss:$16 sps:$4 sm:$0xff]   ;;  %v3020_v2 = vld [vmem:[#allocation7 + $0x1a8] ss:$16 sps:$4 sm:$0xff]   ;;  %v3025_v3 = vld [vmem:[#allocation7 + $0x1c4] ss:$16 sps:$4 sm:$0xff]  }
  0x6f   :  { %1113 = vmatpush1.bf16.msra.mxu1 %v2960_v26  ;;  %1032 = vmatprep.subr.bf16.mxu0 %v2965_v27  ;;  %v3028_v4 = vld [vmem:[#allocation7 + $0x1cc] ss:$16 sps:$4 sm:$0xff]   ;;  %v3023_v5 = vld [vmem:[#allocation7 + $0x1c0] ss:$16 sps:$4 sm:$0xff]   ;;  %v3026_v6 = vld [vmem:[#allocation7 + $0x1c8] ss:$16 sps:$4 sm:$0xff]  }
  0x70   :  { %1114 = vmatprep.subr.bf16.mxu1 %v2968_v28  ;;  %v3031_v7 = vld [vmem:[#allocation7 + $0x1e4] ss:$16 sps:$4 sm:$0xff]   ;;  %v3034_v8 = vld [vmem:[#allocation7 + $0x1ec] ss:$16 sps:$4 sm:$0xff]   ;;  %v3029_v9 = vld [vmem:[#allocation7 + $0x1e0] ss:$16 sps:$4 sm:$0xff]  }
  0x71   :  { %v3032_v10 = vld [vmem:[#allocation7 + $0x1e8] ss:$16 sps:$4 sm:$0xff]   ;;  %v3037_v11 = vld [vmem:[#allocation7 + $0x204] ss:$16 sps:$4 sm:$0xff]   ;;  %v3040_v12 = vld [vmem:[#allocation7 + $0x20c] ss:$16 sps:$4 sm:$0xff]  }
  0x72   :  { %1033 = vmatpush1.bf16.msra.mxu0 %v2963_v29 }
  0x73   :  { %1115 = vmatpush1.bf16.msra.mxu1 %v2966_v30  ;;  %1034 = vmatprep.subr.bf16.mxu0 %v2971_v31 }
  0x74   :  { %1116 = vmatprep.subr.bf16.mxu1 %v2974_v32 }
  0x76   :  { %1035 = vmatpush1.bf16.msra.mxu0 %v2969_v33 }
  0x77   :  { %1117 = vmatpush1.bf16.msra.mxu1 %v2972_v34  ;;  %1036 = vmatprep.subr.bf16.mxu0 %v2977_v35 }
  0x78   :  { %1118 = vmatprep.subr.bf16.mxu1 %v2980_v37  ;;  %v3038_v37 = vld [vmem:[#allocation7 + $0x208] ss:$16 sps:$4 sm:$0xff]  }
  0x7a   :  { %1037 = vmatpush1.bf16.msra.mxu0 %v2975_v36  ;;  %v3035_v36 = vld [vmem:[#allocation7 + $0x200] ss:$16 sps:$4 sm:$0xff]  }
  0x7b   :  { %1119 = vmatpush1.bf16.msra.mxu1 %v2978_v38  ;;  %1038 = vmatprep.subr.bf16.mxu0 %v2983_v39 }
  0x7c   :  { %1120 = vmatprep.subr.bf16.mxu1 %v2986_v40  ;;  %v3043_v40 = vld [vmem:[#allocation7 + $0x224] ss:$16 sps:$4 sm:$0xff]  }
  0x7e   :  { %1039 = vmatpush1.bf16.msra.mxu0 %v2981_v41  ;;  %v3046_v41 = vld [vmem:[#allocation7 + $0x22c] ss:$16 sps:$4 sm:$0xff]  }
  0x7f   :  { %1121 = vmatpush1.bf16.msra.mxu1 %v2984_v42  ;;  %1040 = vmatprep.subr.bf16.mxu0 %v2989_v43  ;;  %v3041_v43 = vld [vmem:[#allocation7 + $0x220] ss:$16 sps:$4 sm:$0xff]  }
  0x80   :  { %1122 = vmatprep.subr.bf16.mxu1 %v2992_v44  ;;  %v3044_v44 = vld [vmem:[#allocation7 + $0x228] ss:$16 sps:$4 sm:$0xff]  }
  0x82   :  { %1041 = vmatpush1.bf16.msra.mxu0 %v2987_v45  ;;  %v3049_v45 = vld [vmem:[#allocation7 + $0x244] ss:$16 sps:$4 sm:$0xff]  }
  0x83   :  { %1123 = vmatpush1.bf16.msra.mxu1 %v2990_v46  ;;  %1042 = vmatprep.subr.bf16.mxu0 %v2995_v47  ;;  %v3052_v46 = vld [vmem:[#allocation7 + $0x24c] ss:$16 sps:$4 sm:$0xff]   ;;  %v3047_v47 = vld [vmem:[#allocation7 + $0x240] ss:$16 sps:$4 sm:$0xff]  }
  0x84   :  { %1124 = vmatprep.subr.bf16.mxu1 %v2998_v48  ;;  %v3050_v48 = vld [vmem:[#allocation7 + $0x248] ss:$16 sps:$4 sm:$0xff]  }
  0x86   :  { %1043 = vmatpush1.bf16.msra.mxu0 %v2993_v49  ;;  %v3055_v49 = vld [vmem:[#allocation7 + $0x264] ss:$16 sps:$4 sm:$0xff]  }
  0x87   :  { %1125 = vmatpush1.bf16.msra.mxu1 %v2996_v50  ;;  %1044 = vmatprep.subr.bf16.mxu0 %v3001_v51  ;;  %v3058_v50 = vld [vmem:[#allocation7 + $0x26c] ss:$16 sps:$4 sm:$0xff]   ;;  %v3053_v51 = vld [vmem:[#allocation7 + $0x260] ss:$16 sps:$4 sm:$0xff]  }
  0x88   :  { %1126 = vmatprep.subr.bf16.mxu1 %v3004_v52  ;;  %v3056_v52 = vld [vmem:[#allocation7 + $0x268] ss:$16 sps:$4 sm:$0xff]  }
  0x8a   :  { %1045 = vmatpush1.bf16.msra.mxu0 %v2999_v53  ;;  %v3061_v53 = vld [vmem:[#allocation7 + $0x284] ss:$16 sps:$4 sm:$0xff]  }
  0x8b   :  { %1127 = vmatpush1.bf16.msra.mxu1 %v3002_v54  ;;  %1046 = vmatprep.subr.bf16.mxu0 %v3007_v55  ;;  %v3064_v54 = vld [vmem:[#allocation7 + $0x28c] ss:$16 sps:$4 sm:$0xff]   ;;  %v3059_v55 = vld [vmem:[#allocation7 + $0x280] ss:$16 sps:$4 sm:$0xff]  }
  0x8c   :  { %1128 = vmatprep.subr.bf16.mxu1 %v3010_v56  ;;  %v3062_v56 = vld [vmem:[#allocation7 + $0x288] ss:$16 sps:$4 sm:$0xff]  }
  0x8e   :  { %1047 = vmatpush1.bf16.msra.mxu0 %v3005_v57  ;;  %v3067_v57 = vld [vmem:[#allocation7 + $0x2a4] ss:$16 sps:$4 sm:$0xff]  }
  0x8f   :  { %1129 = vmatpush1.bf16.msra.mxu1 %v3008_v58  ;;  %1048 = vmatprep.subr.bf16.mxu0 %v3013_v59  ;;  %v3070_v58 = vld [vmem:[#allocation7 + $0x2ac] ss:$16 sps:$4 sm:$0xff]   ;;  %v3065_v59 = vld [vmem:[#allocation7 + $0x2a0] ss:$16 sps:$4 sm:$0xff]  }
  0x90   :  { %1130 = vmatprep.subr.bf16.mxu1 %v3016_v60  ;;  %v3068_v60 = vld [vmem:[#allocation7 + $0x2a8] ss:$16 sps:$4 sm:$0xff]  }
  0x92   :  { %1049 = vmatpush1.bf16.msra.mxu0 %v3011_v61  ;;  %v3073_v61 = vld [vmem:[#allocation7 + $0x2c4] ss:$16 sps:$4 sm:$0xff]  }
  0x93   :  { %1131 = vmatpush1.bf16.msra.mxu1 %v3014_v62  ;;  %1050 = vmatprep.subr.bf16.mxu0 %v3019_v63  ;;  %v3076_v62 = vld [vmem:[#allocation7 + $0x2cc] ss:$16 sps:$4 sm:$0xff]   ;;  %v3071_v63 = vld [vmem:[#allocation7 + $0x2c0] ss:$16 sps:$4 sm:$0xff]  }
  0x94   :  { %1132 = vmatprep.subr.bf16.mxu1 %v3022_v0  ;;  %v3074_v0 = vld [vmem:[#allocation7 + $0x2c8] ss:$16 sps:$4 sm:$0xff]  }
  0x96   :  { %1051 = vmatpush1.bf16.msra.mxu0 %v3017_v1  ;;  %v3079_v1 = vld [vmem:[#allocation7 + $0x2e4] ss:$16 sps:$4 sm:$0xff]  }
  0x97   :  { %1133 = vmatpush1.bf16.msra.mxu1 %v3020_v2  ;;  %1052 = vmatprep.subr.bf16.mxu0 %v3025_v3  ;;  %v3082_v2 = vld [vmem:[#allocation7 + $0x2ec] ss:$16 sps:$4 sm:$0xff]   ;;  %v3077_v3 = vld [vmem:[#allocation7 + $0x2e0] ss:$16 sps:$4 sm:$0xff]  }
  0x98   :  { %1134 = vmatprep.subr.bf16.mxu1 %v3028_v4  ;;  %v3080_v4 = vld [vmem:[#allocation7 + $0x2e8] ss:$16 sps:$4 sm:$0xff]  }
  0x9a   :  { %1053 = vmatpush1.bf16.msra.mxu0 %v3023_v5  ;;  %v3085_v5 = vld [vmem:[#allocation7 + $0x304] ss:$16 sps:$4 sm:$0xff]  }
  0x9b   :  { %1135 = vmatpush1.bf16.msra.mxu1 %v3026_v6  ;;  %1054 = vmatprep.subr.bf16.mxu0 %v3031_v7  ;;  %v3088_v6 = vld [vmem:[#allocation7 + $0x30c] ss:$16 sps:$4 sm:$0xff]   ;;  %v3083_v7 = vld [vmem:[#allocation7 + $0x300] ss:$16 sps:$4 sm:$0xff]  }
  0x9c   :  { %1136 = vmatprep.subr.bf16.mxu1 %v3034_v8  ;;  %v3086_v8 = vld [vmem:[#allocation7 + $0x308] ss:$16 sps:$4 sm:$0xff]  }
  0x9e   :  { %1055 = vmatpush1.bf16.msra.mxu0 %v3029_v9  ;;  %v3091_v9 = vld [vmem:[#allocation7 + $0x324] ss:$16 sps:$4 sm:$0xff]  }
  0x9f   :  { %1137 = vmatpush1.bf16.msra.mxu1 %v3032_v10  ;;  %1065 = vmatprep.subr.bf16.mxu0 %v3037_v11  ;;  %v3094_v10 = vld [vmem:[#allocation7 + $0x32c] ss:$16 sps:$4 sm:$0xff]  }
  0xa0   :  { %1147 = vmatprep.subr.bf16.mxu1 %v3040_v12  ;;  %v3089_v12 = vld [vmem:[#allocation7 + $0x320] ss:$16 sps:$4 sm:$0xff]  }
 0x134   :  { %v162_v13 = vpop.f32.mrb[0].mxu0 }
 0x135   :  { %v210_v14 = vpack.c.bf16 %v162_v13, %v162_v13  ;;  %v164_v15 = vpop.f32.mrb[1].mxu0  ;;  %v3643_v16 = vpop.f32.mrb[0].mxu1  ;;  %v3092_v13 = vld [vmem:[#allocation7 + $0x328] ss:$16 sps:$4 sm:$0xff]  }
 0x136   :  { %v211_v17 = vpack.c.bf16 %v164_v15, %v164_v15  ;;  %v166_v18 = vpop.f32.mrb[2].mxu0  ;;  %v205_v19 = vpop.f32.mrb[1].mxu1  ;;  %v3647_v11 = vpack.c.bf16 %v3643_v16, %v3643_v16  ;;  %v3100_v15 = vld [vmem:[#allocation7 + $0x34c] ss:$16 sps:$4 sm:$0xff]   ;;  %v3101_v16 = vld [vmem:[#allocation7 + $0x360] ss:$16 sps:$4 sm:$0xff]  }
 0x137   :  { %v214_v20 = vmul.bf16 1056980736, %v210_v14  ;;  %v167_v21 = vpop.f32.mrb[3].mxu0  ;;  %v213_v22 = vpack.c.bf16 %v205_v19, %v205_v19  ;;  %v207_v23 = vpop.f32.mrb[2].mxu1  ;;  %v3095_v18 = vld [vmem:[#allocation7 + $0x340] ss:$16 sps:$4 sm:$0xff]  }
 0x138   :  { %v215_v24 = vmul.bf16 1056980736, %v211_v17  ;;  %v208_v25 = vpop.f32.mrb[3].mxu1  ;;  %v3098_v19 = vld [vmem:[#allocation7 + $0x348] ss:$16 sps:$4 sm:$0xff]  }
 0x139   :  { %3355 = vtanh.bf16 %v214_v20  ;;  %v217_v26 = vmul.bf16 1056980736, %v213_v22  ;;  %v3103_v20 = vld [vmem:[#allocation7 + $0x364] ss:$16 sps:$4 sm:$0xff]   ;;  %v3106_v21 = vld [vmem:[#allocation7 + $0x36c] ss:$16 sps:$4 sm:$0xff]  }
 0x13a   :  { %3357 = vtanh.bf16 %v215_v24  ;;  %v3109_v23 = vld [vmem:[#allocation7 + $0x384] ss:$16 sps:$4 sm:$0xff]   ;;  %v3112_v24 = vld [vmem:[#allocation7 + $0x38c] ss:$16 sps:$4 sm:$0xff]   ;;  %v3107_v25 = vld [vmem:[#allocation7 + $0x380] ss:$16 sps:$4 sm:$0xff]  }
 0x13b   :  { %3359 = vtanh.bf16 %v217_v26  ;;  %v3110_v26 = vld [vmem:[#allocation7 + $0x388] ss:$16 sps:$4 sm:$0xff]  }
 0x144   :  { %v3356_v27 = vpop.eup %3355 }
 0x145   :  { %v3358_v28 = vpop.eup %3357  ;;  %v222_v29 = vadd.bf16 1065369472, %v3356_v27  ;;  %v3115_v27 = vld [vmem:[#allocation7 + $0x3a4] ss:$16 sps:$4 sm:$0xff]  }
 0x146   :  { %v223_v30 = vadd.bf16 1065369472, %v3358_v28  ;;  %v3360_v31 = vpop.eup %3359  ;;  %v3118_v28 = vld [vmem:[#allocation7 + $0x3ac] ss:$16 sps:$4 sm:$0xff]  }
 0x147   :  { %v226_v32 = vmul.bf16 1056980736, %v222_v29  ;;  %v225_v34 = vadd.bf16 1065369472, %v3360_v31  ;;  %v3113_v29 = vld [vmem:[#allocation7 + $0x3a0] ss:$16 sps:$4 sm:$0xff]  }
 0x148   :  { %v227_v33 = vmul.bf16 1056980736, %v223_v30  ;;  %v3116_v30 = vld [vmem:[#allocation7 + $0x3a8] ss:$16 sps:$4 sm:$0xff]   ;;  %v3121_v31 = vld [vmem:[#allocation7 + $0x3c4] ss:$16 sps:$4 sm:$0xff]  }
 0x149   :  { %v229_v38 = vmul.bf16 1056980736, %v225_v34  ;;  %v230_v39 = vmul.bf16 %v226_v32, %v210_v14  ;;  %v3097_v14 = vld [vmem:[#allocation7 + $0x344] ss:$16 sps:$4 sm:$0xff]   ;;  %v3124_v32 = vld [vmem:[#allocation7 + $0x3cc] ss:$16 sps:$4 sm:$0xff]  }
 0x14a   :  { %v231_v35 = vmul.bf16 %v227_v33, %v211_v17  ;;  %v216_v17 = vmul.bf16 1056980736, %v3647_v11  ;;  %v3119_v34 = vld [vmem:[#allocation7 + $0x3c0] ss:$16 sps:$4 sm:$0xff]  }
 0x14b   :  { %v233_v42 = vmul.bf16 %v229_v38, %v213_v22  ;;  %v3104_v22 = vld [vmem:[#allocation7 + $0x368] ss:$16 sps:$4 sm:$0xff]   ;;  %v3130_v38 = vld [vmem:[#allocation7 + $0x3ec] ss:$16 sps:$4 sm:$0xff]  }
 0x14c   :  { %1056 = vmatprep.mubr.bf16.mxu0 %v231_v35  ;;  %1138 = vmatprep.mubr.bf16.mxu1 %v231_v35  ;;  %3361 = vtanh.bf16 %v216_v17  ;;  %v3122_v35 = vld [vmem:[#allocation7 + $0x3c8] ss:$16 sps:$4 sm:$0xff]   ;;  %v3190_v17 = vld [vmem:[#allocation8 + $0x12c] ss:$16 sps:$4 sm:$0xff]  }
 0x14d   :  { %1057 = vmatmul.mubr.bf16.vlgmr.msra.gmra.mrb[4].mxu0 %v230_v39  ;;  %1139 = vmatmul.mubr.bf16.vlgmr.msra.gmra.mrb[4].mxu1 %v230_v39  ;;  %v3125_v39 = vld [vmem:[#allocation7 + $0x3e0] ss:$16 sps:$4 sm:$0xff]  }
 0x14e   :  { %1066 = vmatpush1.bf16.msra.mxu0 %v3035_v36  ;;  %1148 = vmatpush1.bf16.msra.mxu1 %v3038_v37  ;;  %v3127_v37 = vld [vmem:[#allocation7 + $0x3e4] ss:$16 sps:$4 sm:$0xff]  }
 0x14f   :  { %1067 = vmatprep.subr.bf16.mxu0 %v3043_v40  ;;  %1149 = vmatprep.subr.bf16.mxu1 %v3046_v41  ;;  %v3128_v40 = vld [vmem:[#allocation7 + $0x3e8] ss:$16 sps:$4 sm:$0xff]  }
 0x150   :  { %1097 = vmatprep.mubr.bf16.mxu0 %v233_v42  ;;  %1179 = vmatprep.mubr.bf16.mxu1 %v233_v42  ;;  %v3133_v42 = vld [vmem:[#allocation8 + $0x4] ss:$16 sps:$4 sm:$0xff]  }
 0x152   :  { %1068 = vmatpush1.bf16.msra.mxu0 %v3041_v43  ;;  %1150 = vmatpush1.bf16.msra.mxu1 %v3044_v44  ;;  %v3136_v43 = vld [vmem:[#allocation8 + $0xc] ss:$16 sps:$4 sm:$0xff]   ;;  %v3131_v44 = vld [vmem:[#allocation8] ss:$16 sps:$4 sm:$0xff]  }
 0x153   :  { %1069 = vmatprep.subr.bf16.mxu0 %v3049_v45  ;;  %1151 = vmatprep.subr.bf16.mxu1 %v3052_v46  ;;  %v3134_v45 = vld [vmem:[#allocation8 + $0x8] ss:$16 sps:$4 sm:$0xff]  }
 0x156   :  { %1070 = vmatpush1.bf16.msra.mxu0 %v3047_v47  ;;  %1152 = vmatpush1.bf16.msra.mxu1 %v3050_v48  ;;  %v3139_v47 = vld [vmem:[#allocation8 + $0x24] ss:$16 sps:$4 sm:$0xff]   ;;  %v3142_v48 = vld [vmem:[#allocation8 + $0x2c] ss:$16 sps:$4 sm:$0xff]  }
 0x157   :  { %1071 = vmatprep.subr.bf16.mxu0 %v3055_v49  ;;  %1153 = vmatprep.subr.bf16.mxu1 %v3058_v50  ;;  %v3362_v33 = vpop.eup %3361  ;;  %v3137_v49 = vld [vmem:[#allocation8 + $0x20] ss:$16 sps:$4 sm:$0xff]   ;;  %v3140_v50 = vld [vmem:[#allocation8 + $0x28] ss:$16 sps:$4 sm:$0xff]  }
 0x158   :  { %v224_v36 = vadd.bf16 1065369472, %v3362_v33  ;;  %v3209_v33 = vld [vmem:[#allocation8 + $0x1a0] ss:$16 sps:$4 sm:$0xff]  }
 0x15a   :  { %1072 = vmatpush1.bf16.msra.mxu0 %v3053_v51  ;;  %1154 = vmatpush1.bf16.msra.mxu1 %v3056_v52  ;;  %v228_v41 = vmul.bf16 1056980736, %v224_v36  ;;  %v3145_v51 = vld [vmem:[#allocation8 + $0x44] ss:$16 sps:$4 sm:$0xff]   ;;  %v3148_v52 = vld [vmem:[#allocation8 + $0x4c] ss:$16 sps:$4 sm:$0xff]  }
 0x15b   :  { %1073 = vmatprep.subr.bf16.mxu0 %v3061_v53  ;;  %1155 = vmatprep.subr.bf16.mxu1 %v3064_v54  ;;  %v3143_v53 = vld [vmem:[#allocation8 + $0x40] ss:$16 sps:$4 sm:$0xff]   ;;  %v3146_v54 = vld [vmem:[#allocation8 + $0x48] ss:$16 sps:$4 sm:$0xff]   ;;  %v3220_v36 = vld [vmem:[#allocation8 + $0x1cc] ss:$16 sps:$4 sm:$0xff]  }
 0x15c   :  { %v232_v46 = vmul.bf16 %v228_v41, %v3647_v11  ;;  %v3181_v11 = vld [vmem:[#allocation8 + $0x104] ss:$16 sps:$4 sm:$0xff]   ;;  %v3221_v41 = vld [vmem:[#allocation8 + $0x1e0] ss:$16 sps:$4 sm:$0xff]  }
 0x15e   :  { %1074 = vmatpush1.bf16.msra.mxu0 %v3059_v55  ;;  %1156 = vmatpush1.bf16.msra.mxu1 %v3062_v56  ;;  %v3151_v55 = vld [vmem:[#allocation8 + $0x64] ss:$16 sps:$4 sm:$0xff]   ;;  %v3154_v56 = vld [vmem:[#allocation8 + $0x6c] ss:$16 sps:$4 sm:$0xff]  }
 0x15f   :  { %1075 = vmatprep.subr.bf16.mxu0 %v3067_v57  ;;  %1157 = vmatprep.subr.bf16.mxu1 %v3070_v58  ;;  %v3149_v57 = vld [vmem:[#allocation8 + $0x60] ss:$16 sps:$4 sm:$0xff]   ;;  %v3152_v58 = vld [vmem:[#allocation8 + $0x68] ss:$16 sps:$4 sm:$0xff]  }
 0x162   :  { %1076 = vmatpush1.bf16.msra.mxu0 %v3065_v59  ;;  %1158 = vmatpush1.bf16.msra.mxu1 %v3068_v60  ;;  %v3157_v59 = vld [vmem:[#allocation8 + $0x84] ss:$16 sps:$4 sm:$0xff]   ;;  %v3160_v60 = vld [vmem:[#allocation8 + $0x8c] ss:$16 sps:$4 sm:$0xff]  }
 0x163   :  { %1077 = vmatprep.subr.bf16.mxu0 %v3073_v61  ;;  %1159 = vmatprep.subr.bf16.mxu1 %v3076_v62  ;;  %v3155_v61 = vld [vmem:[#allocation8 + $0x80] ss:$16 sps:$4 sm:$0xff]   ;;  %v3158_v62 = vld [vmem:[#allocation8 + $0x88] ss:$16 sps:$4 sm:$0xff]  }
 0x166   :  { %1078 = vmatpush1.bf16.msra.mxu0 %v3071_v63  ;;  %1160 = vmatpush1.bf16.msra.mxu1 %v3074_v0  ;;  %v3163_v63 = vld [vmem:[#allocation8 + $0xa4] ss:$16 sps:$4 sm:$0xff]   ;;  %v3166_v0 = vld [vmem:[#allocation8 + $0xac] ss:$16 sps:$4 sm:$0xff]  }
 0x167   :  { %1079 = vmatprep.subr.bf16.mxu0 %v3079_v1  ;;  %1161 = vmatprep.subr.bf16.mxu1 %v3082_v2  ;;  %v3161_v1 = vld [vmem:[#allocation8 + $0xa0] ss:$16 sps:$4 sm:$0xff]   ;;  %v3164_v2 = vld [vmem:[#allocation8 + $0xa8] ss:$16 sps:$4 sm:$0xff]  }
 0x16a   :  { %1080 = vmatpush1.bf16.msra.mxu0 %v3077_v3  ;;  %1162 = vmatpush1.bf16.msra.mxu1 %v3080_v4  ;;  %v3169_v3 = vld [vmem:[#allocation8 + $0xc4] ss:$16 sps:$4 sm:$0xff]   ;;  %v3172_v4 = vld [vmem:[#allocation8 + $0xcc] ss:$16 sps:$4 sm:$0xff]  }
 0x16b   :  { %1081 = vmatprep.subr.bf16.mxu0 %v3085_v5  ;;  %1163 = vmatprep.subr.bf16.mxu1 %v3088_v6  ;;  %v3167_v5 = vld [vmem:[#allocation8 + $0xc0] ss:$16 sps:$4 sm:$0xff]   ;;  %v3170_v6 = vld [vmem:[#allocation8 + $0xc8] ss:$16 sps:$4 sm:$0xff]  }
 0x16e   :  { %1082 = vmatpush1.bf16.msra.mxu0 %v3083_v7  ;;  %1164 = vmatpush1.bf16.msra.mxu1 %v3086_v8  ;;  %v3175_v7 = vld [vmem:[#allocation8 + $0xe4] ss:$16 sps:$4 sm:$0xff]   ;;  %v3178_v8 = vld [vmem:[#allocation8 + $0xec] ss:$16 sps:$4 sm:$0xff]  }
 0x16f   :  { %1083 = vmatprep.subr.bf16.mxu0 %v3091_v9  ;;  %1165 = vmatprep.subr.bf16.mxu1 %v3094_v10  ;;  %v3173_v9 = vld [vmem:[#allocation8 + $0xe0] ss:$16 sps:$4 sm:$0xff]   ;;  %v3176_v10 = vld [vmem:[#allocation8 + $0xe8] ss:$16 sps:$4 sm:$0xff]  }
 0x172   :  { %1084 = vmatpush1.bf16.msra.mxu0 %v3089_v12  ;;  %1166 = vmatpush1.bf16.msra.mxu1 %v3092_v13  ;;  %v3184_v12 = vld [vmem:[#allocation8 + $0x10c] ss:$16 sps:$4 sm:$0xff]   ;;  %v3179_v13 = vld [vmem:[#allocation8 + $0x100] ss:$16 sps:$4 sm:$0xff]  }
 0x173   :  { %1085 = vmatprep.subr.bf16.mxu0 %v3097_v14  ;;  %1167 = vmatprep.subr.bf16.mxu1 %v3100_v15  ;;  %v3182_v14 = vld [vmem:[#allocation8 + $0x108] ss:$16 sps:$4 sm:$0xff]   ;;  %v3187_v15 = vld [vmem:[#allocation8 + $0x124] ss:$16 sps:$4 sm:$0xff]  }
 0x176   :  { %1086 = vmatpush1.bf16.msra.mxu0 %v3095_v18  ;;  %1168 = vmatpush1.bf16.msra.mxu1 %v3098_v19  ;;  %v3185_v18 = vld [vmem:[#allocation8 + $0x120] ss:$16 sps:$4 sm:$0xff]   ;;  %v3188_v19 = vld [vmem:[#allocation8 + $0x128] ss:$16 sps:$4 sm:$0xff]  }
 0x177   :  { %1087 = vmatprep.subr.bf16.mxu0 %v3103_v20  ;;  %1169 = vmatprep.subr.bf16.mxu1 %v3106_v21  ;;  %v3193_v20 = vld [vmem:[#allocation8 + $0x144] ss:$16 sps:$4 sm:$0xff]   ;;  %v3196_v21 = vld [vmem:[#allocation8 + $0x14c] ss:$16 sps:$4 sm:$0xff]  }
 0x17a   :  { %1088 = vmatpush1.bf16.msra.mxu0 %v3101_v16  ;;  %1170 = vmatpush1.bf16.msra.mxu1 %v3104_v22  ;;  %v3191_v16 = vld [vmem:[#allocation8 + $0x140] ss:$16 sps:$4 sm:$0xff]   ;;  %v3194_v22 = vld [vmem:[#allocation8 + $0x148] ss:$16 sps:$4 sm:$0xff]  }
 0x17b   :  { %1089 = vmatprep.subr.bf16.mxu0 %v3109_v23  ;;  %1171 = vmatprep.subr.bf16.mxu1 %v3112_v24  ;;  %v3199_v23 = vld [vmem:[#allocation8 + $0x164] ss:$16 sps:$4 sm:$0xff]   ;;  %v3202_v24 = vld [vmem:[#allocation8 + $0x16c] ss:$16 sps:$4 sm:$0xff]  }
 0x17e   :  { %1090 = vmatpush1.bf16.msra.mxu0 %v3107_v25  ;;  %1172 = vmatpush1.bf16.msra.mxu1 %v3110_v26  ;;  %v3197_v25 = vld [vmem:[#allocation8 + $0x160] ss:$16 sps:$4 sm:$0xff]   ;;  %v3200_v26 = vld [vmem:[#allocation8 + $0x168] ss:$16 sps:$4 sm:$0xff]  }
 0x17f   :  { %1091 = vmatprep.subr.bf16.mxu0 %v3115_v27  ;;  %1173 = vmatprep.subr.bf16.mxu1 %v3118_v28  ;;  %v3205_v27 = vld [vmem:[#allocation8 + $0x184] ss:$16 sps:$4 sm:$0xff]   ;;  %v3208_v28 = vld [vmem:[#allocation8 + $0x18c] ss:$16 sps:$4 sm:$0xff]  }
 0x182   :  { %1092 = vmatpush1.bf16.msra.mxu0 %v3113_v29  ;;  %1174 = vmatpush1.bf16.msra.mxu1 %v3116_v30  ;;  %v3203_v29 = vld [vmem:[#allocation8 + $0x180] ss:$16 sps:$4 sm:$0xff]   ;;  %v3206_v30 = vld [vmem:[#allocation8 + $0x188] ss:$16 sps:$4 sm:$0xff]  }
 0x183   :  { %1093 = vmatprep.subr.bf16.mxu0 %v3121_v31  ;;  %1175 = vmatprep.subr.bf16.mxu1 %v3124_v32  ;;  %v3211_v31 = vld [vmem:[#allocation8 + $0x1a4] ss:$16 sps:$4 sm:$0xff]   ;;  %v3214_v32 = vld [vmem:[#allocation8 + $0x1ac] ss:$16 sps:$4 sm:$0xff]  }
 0x186   :  { %1094 = vmatpush1.bf16.msra.mxu0 %v3119_v34  ;;  %1176 = vmatpush1.bf16.msra.mxu1 %v3122_v35  ;;  %v3212_v34 = vld [vmem:[#allocation8 + $0x1a8] ss:$16 sps:$4 sm:$0xff]   ;;  %v3217_v35 = vld [vmem:[#allocation8 + $0x1c4] ss:$16 sps:$4 sm:$0xff]  }
 0x187   :  { %1095 = vmatprep.subr.bf16.mxu0 %v3127_v37  ;;  %1177 = vmatprep.subr.bf16.mxu1 %v3130_v38  ;;  %v3215_v37 = vld [vmem:[#allocation8 + $0x1c0] ss:$16 sps:$4 sm:$0xff]   ;;  %v3218_v38 = vld [vmem:[#allocation8 + $0x1c8] ss:$16 sps:$4 sm:$0xff]  }
 0x18a   :  { %1096 = vmatpush1.bf16.msra.mxu0 %v3125_v39  ;;  %1178 = vmatpush1.bf16.msra.mxu1 %v3128_v40  ;;  %v3223_v39 = vld [vmem:[#allocation8 + $0x1e4] ss:$16 sps:$4 sm:$0xff]   ;;  %v3226_v40 = vld [vmem:[#allocation8 + $0x1ec] ss:$16 sps:$4 sm:$0xff]  }
 0x18b   :  { %2002 = vmatprep.subr.bf16.mxu0 %v3133_v42  ;;  %2084 = vmatprep.subr.bf16.mxu1 %v3136_v43  ;;  %v3224_v42 = vld [vmem:[#allocation8 + $0x1e8] ss:$16 sps:$4 sm:$0xff]   ;;  %v3229_v43 = vld [vmem:[#allocation8 + $0x204] ss:$16 sps:$4 sm:$0xff]  }
 0x18d   :  { %1098 = vmatmul.mubr.bf16.vlgmr.msra.gmra.mrb[4].mxu0 %v232_v46  ;;  %1180 = vmatmul.mubr.bf16.vlgmr.msra.gmra.mrb[4].mxu1 %v232_v46 }
 0x18e   :  { %2003 = vmatpush1.bf16.msra.mxu0 %v3131_v44  ;;  %2085 = vmatpush1.bf16.msra.mxu1 %v3134_v45  ;;  %v3232_v44 = vld [vmem:[#allocation8 + $0x20c] ss:$16 sps:$4 sm:$0xff]   ;;  %v364_v45 = vlaneseq }
 0x18f   :  { %2004 = vmatprep.subr.bf16.mxu0 %v3139_v47  ;;  %2086 = vmatprep.subr.bf16.mxu1 %v3142_v48  ;;  %v3658_v48 = vld [vmem:[%s3712_s3] sm:$0xf] }
 0x190   :  { %v3652_v46 = vshrl.u32 %v364_v45, 7 }
 0x192   :  { %2005 = vmatpush1.bf16.msra.mxu0 %v3137_v49  ;;  %2087 = vmatpush1.bf16.msra.mxu1 %v3140_v50  ;;  %v366_v47 = vsub.s32 0, %v3652_v46  ;;  %v370_v49 = vsub.s32 1, %v3652_v46  ;;  %v378_v50 = vsub.s32 3, %v3652_v46 }
 0x193   :  { %2006 = vmatprep.subr.bf16.mxu0 %v3145_v51  ;;  %2088 = vmatprep.subr.bf16.mxu1 %v3148_v52 }
 0x194   :  { %v367_v51 = vrot.slane %v3658_v48, %v366_v47  ;;  %v371_v52 = vrot.slane %v3658_v48, %v370_v49 }
 0x196   :  { %2007 = vmatpush1.bf16.msra.mxu0 %v3143_v53  ;;  %2089 = vmatpush1.bf16.msra.mxu1 %v3146_v54  ;;  %v379_v53 = vrot.slane %v3658_v48, %v378_v50 }
 0x197   :  { %2008 = vmatprep.subr.bf16.mxu0 %v3151_v55  ;;  %2090 = vmatprep.subr.bf16.mxu1 %v3154_v56 }
 0x19a   :  { %2009 = vmatpush1.bf16.msra.mxu0 %v3149_v57  ;;  %2091 = vmatpush1.bf16.msra.mxu1 %v3152_v58 }
 0x19b   :  { %2010 = vmatprep.subr.bf16.mxu0 %v3157_v59  ;;  %2092 = vmatprep.subr.bf16.mxu1 %v3160_v60 }
 0x19e   :  { %2011 = vmatpush1.bf16.msra.mxu0 %v3155_v61  ;;  %2093 = vmatpush1.bf16.msra.mxu1 %v3158_v62 }
 0x19f   :  { %2012 = vmatprep.subr.bf16.mxu0 %v3163_v63  ;;  %2094 = vmatprep.subr.bf16.mxu1 %v3166_v0 }
 0x1a2   :  { %2013 = vmatpush1.bf16.msra.mxu0 %v3161_v1  ;;  %2095 = vmatpush1.bf16.msra.mxu1 %v3164_v2 }
 0x1a3   :  { %2014 = vmatprep.subr.bf16.mxu0 %v3169_v3  ;;  %2096 = vmatprep.subr.bf16.mxu1 %v3172_v4 }
 0x1a6   :  { %2015 = vmatpush1.bf16.msra.mxu0 %v3167_v5  ;;  %2097 = vmatpush1.bf16.msra.mxu1 %v3170_v6 }
 0x1a7   :  { %2016 = vmatprep.subr.bf16.mxu0 %v3175_v7  ;;  %2098 = vmatprep.subr.bf16.mxu1 %v3178_v8 }
 0x1aa   :  { %2017 = vmatpush1.bf16.msra.mxu0 %v3173_v9  ;;  %2099 = vmatpush1.bf16.msra.mxu1 %v3176_v10 }
 0x1ab   :  { %2018 = vmatprep.subr.bf16.mxu0 %v3181_v11  ;;  %2100 = vmatprep.subr.bf16.mxu1 %v3184_v12 }
 0x1ae   :  { %2019 = vmatpush1.bf16.msra.mxu0 %v3179_v13  ;;  %2101 = vmatpush1.bf16.msra.mxu1 %v3182_v14 }
 0x1af   :  { %2020 = vmatprep.subr.bf16.mxu0 %v3187_v15  ;;  %2102 = vmatprep.subr.bf16.mxu1 %v3190_v17 }
 0x1b2   :  { %2021 = vmatpush1.bf16.msra.mxu0 %v3185_v18  ;;  %2103 = vmatpush1.bf16.msra.mxu1 %v3188_v19  ;;  %v3227_v18 = vld [vmem:[#allocation8 + $0x200] ss:$16 sps:$4 sm:$0xff]   ;;  %v3230_v19 = vld [vmem:[#allocation8 + $0x208] ss:$16 sps:$4 sm:$0xff]  }
 0x1b3   :  { %2022 = vmatprep.subr.bf16.mxu0 %v3193_v20  ;;  %2104 = vmatprep.subr.bf16.mxu1 %v3196_v21  ;;  %v3235_v21 = vld [vmem:[#allocation8 + $0x224] ss:$16 sps:$4 sm:$0xff]  }
 0x1b6   :  { %2023 = vmatpush1.bf16.msra.mxu0 %v3191_v16  ;;  %2105 = vmatpush1.bf16.msra.mxu1 %v3194_v22  ;;  %v3238_v16 = vld [vmem:[#allocation8 + $0x22c] ss:$16 sps:$4 sm:$0xff]  }
 0x1b7   :  { %2024 = vmatprep.subr.bf16.mxu0 %v3199_v23  ;;  %2106 = vmatprep.subr.bf16.mxu1 %v3202_v24  ;;  %v3233_v23 = vld [vmem:[#allocation8 + $0x220] ss:$16 sps:$4 sm:$0xff]   ;;  %v3236_v24 = vld [vmem:[#allocation8 + $0x228] ss:$16 sps:$4 sm:$0xff]  }
 0x1ba   :  { %2025 = vmatpush1.bf16.msra.mxu0 %v3197_v25  ;;  %2107 = vmatpush1.bf16.msra.mxu1 %v3200_v26  ;;  %v3241_v25 = vld [vmem:[#allocation8 + $0x244] ss:$16 sps:$4 sm:$0xff]   ;;  %v3244_v26 = vld [vmem:[#allocation8 + $0x24c] ss:$16 sps:$4 sm:$0xff]  }
 0x1bb   :  { %2026 = vmatprep.subr.bf16.mxu0 %v3205_v27  ;;  %2108 = vmatprep.subr.bf16.mxu1 %v3208_v28  ;;  %v3239_v27 = vld [vmem:[#allocation8 + $0x240] ss:$16 sps:$4 sm:$0xff]   ;;  %v3242_v28 = vld [vmem:[#allocation8 + $0x248] ss:$16 sps:$4 sm:$0xff]  }
 0x1be   :  { %2027 = vmatpush1.bf16.msra.mxu0 %v3203_v29  ;;  %2109 = vmatpush1.bf16.msra.mxu1 %v3206_v30  ;;  %v3247_v29 = vld [vmem:[#allocation8 + $0x264] ss:$16 sps:$4 sm:$0xff]   ;;  %v3250_v30 = vld [vmem:[#allocation8 + $0x26c] ss:$16 sps:$4 sm:$0xff]  }
 0x1bf   :  { %2028 = vmatprep.subr.bf16.mxu0 %v3211_v31  ;;  %2110 = vmatprep.subr.bf16.mxu1 %v3214_v32  ;;  %v3245_v31 = vld [vmem:[#allocation8 + $0x260] ss:$16 sps:$4 sm:$0xff]   ;;  %v3248_v32 = vld [vmem:[#allocation8 + $0x268] ss:$16 sps:$4 sm:$0xff]  }
 0x1c2   :  { %2029 = vmatpush1.bf16.msra.mxu0 %v3209_v33  ;;  %2111 = vmatpush1.bf16.msra.mxu1 %v3212_v34  ;;  %v3253_v33 = vld [vmem:[#allocation8 + $0x284] ss:$16 sps:$4 sm:$0xff]   ;;  %v3256_v34 = vld [vmem:[#allocation8 + $0x28c] ss:$16 sps:$4 sm:$0xff]  }
 0x1c3   :  { %2030 = vmatprep.subr.bf16.mxu0 %v3217_v35  ;;  %2112 = vmatprep.subr.bf16.mxu1 %v3220_v36  ;;  %v3251_v35 = vld [vmem:[#allocation8 + $0x280] ss:$16 sps:$4 sm:$0xff]   ;;  %v3254_v36 = vld [vmem:[#allocation8 + $0x288] ss:$16 sps:$4 sm:$0xff]  }
 0x1c6   :  { %2031 = vmatpush1.bf16.msra.mxu0 %v3215_v37  ;;  %2113 = vmatpush1.bf16.msra.mxu1 %v3218_v38  ;;  %v3259_v37 = vld [vmem:[#allocation8 + $0x2a4] ss:$16 sps:$4 sm:$0xff]   ;;  %v3262_v38 = vld [vmem:[#allocation8 + $0x2ac] ss:$16 sps:$4 sm:$0xff]  }
 0x1c7   :  { %2032 = vmatprep.subr.bf16.mxu0 %v3223_v39  ;;  %2114 = vmatprep.subr.bf16.mxu1 %v3226_v40  ;;  %v3257_v39 = vld [vmem:[#allocation8 + $0x2a0] ss:$16 sps:$4 sm:$0xff]   ;;  %v3260_v40 = vld [vmem:[#allocation8 + $0x2a8] ss:$16 sps:$4 sm:$0xff]  }
 0x1ca   :  { %2033 = vmatpush1.bf16.msra.mxu0 %v3221_v41  ;;  %2115 = vmatpush1.bf16.msra.mxu1 %v3224_v42  ;;  %v3265_v41 = vld [vmem:[#allocation8 + $0x2c4] ss:$16 sps:$4 sm:$0xff]   ;;  %v3268_v42 = vld [vmem:[#allocation8 + $0x2cc] ss:$16 sps:$4 sm:$0xff]  }
 0x1cb   :  { %2043 = vmatprep.subr.bf16.mxu0 %v3229_v43  ;;  %2125 = vmatprep.subr.bf16.mxu1 %v3232_v44  ;;  %v374_v43 = vsub.s32 2, %v3652_v46  ;;  %v3263_v44 = vld [vmem:[#allocation8 + $0x2c0] ss:$16 sps:$4 sm:$0xff]  }
 0x260   :  { %v1099_v54 = vpop.f32.mrb[4].mxu0  ;;  %v3671_v55 = vpop.f32.mrb[4].mxu1 }
 0x261   :  { %v2900_v56 = vadd.f32 %v1099_v54, %v367_v51  ;;  %v1101_v57 = vpop.f32.mrb[5].mxu0  ;;  %v1183_v58 = vpop.f32.mrb[5].mxu1  ;;  %v3266_v51 = vld [vmem:[#allocation8 + $0x2c8] ss:$16 sps:$4 sm:$0xff]   ;;  %v375_v54 = vrot.slane %v3658_v48, %v374_v43  ;;  %v3281_v48 = vld [vmem:[#allocation8 + $0x320] ss:$16 sps:$4 sm:$0xff]  }
 0x262   :  { %v2901_v59 = vadd.f32 %v1101_v57, %v371_v52  ;;  %v2903_v60 = vadd.f32 %v1183_v58, %v379_v53  ;;  %v1103_v61 = vpop.f32.mrb[6].mxu0  ;;  %v1185_v62 = vpop.f32.mrb[6].mxu1  ;;  %v3271_v52 = vld [vmem:[#allocation8 + $0x2e4] ss:$16 sps:$4 sm:$0xff]   ;;  %v3274_v53 = vld [vmem:[#allocation8 + $0x2ec] ss:$16 sps:$4 sm:$0xff]  }
 0x263   :  { %v1188_v63 = vpack.c.bf16 %v2900_v56, %v2900_v56  ;;  %v1104_v0 = vpop.f32.mrb[7].mxu0  ;;  %v1186_v1 = vpop.f32.mrb[7].mxu1  ;;  %v3269_v56 = vld [vmem:[#allocation8 + $0x2e0] ss:$16 sps:$4 sm:$0xff]   ;;  %v3272_v57 = vld [vmem:[#allocation8 + $0x2e8] ss:$16 sps:$4 sm:$0xff]  }
 0x264   :  { %v1189_v2 = vpack.c.bf16 %v2901_v59, %v2901_v59  ;;  %v1191_v3 = vpack.c.bf16 %v2903_v60, %v2903_v60  ;;  %v3277_v58 = vld [vmem:[#allocation8 + $0x304] ss:$16 sps:$4 sm:$0xff]   ;;  %v3280_v59 = vld [vmem:[#allocation8 + $0x30c] ss:$16 sps:$4 sm:$0xff]   ;;  %v2902_v60 = vadd.f32 %v3671_v55, %v375_v54  ;;  %v3275_v61 = vld [vmem:[#allocation8 + $0x300] ss:$16 sps:$4 sm:$0xff]  }
 0x265   :  { %v1192_v4 = vmul.bf16 1056980736, %v1188_v63  ;;  %v3278_v62 = vld [vmem:[#allocation8 + $0x308] ss:$16 sps:$4 sm:$0xff]   ;;  %v3286_v0 = vld [vmem:[#allocation8 + $0x32c] ss:$16 sps:$4 sm:$0xff]  }
 0x266   :  { %v1193_v5 = vmul.bf16 1056980736, %v1189_v2  ;;  %v1195_v6 = vmul.bf16 1056980736, %v1191_v3  ;;  %v3678_v1 = vpack.c.bf16 %v2902_v60, %v2902_v60  ;;  %v3339_v54 = vld [vmem:[#allocation10 + $0x60] sm:$0xff]   ;;  %v3344_v60 = vld [vmem:[#allocation10 + $0xe8] sm:$0xff]  }
 0x267   :  { %3363 = vtanh.bf16 %v1192_v4  ;;  %v3292_v4 = vld [vmem:[#allocation8 + $0x34c] ss:$16 sps:$4 sm:$0xff]  }
 0x268   :  { %3365 = vtanh.bf16 %v1193_v5  ;;  %v1194_v55 = vmul.bf16 1056980736, %v3678_v1  ;;  %v3287_v5 = vld [vmem:[#allocation8 + $0x340] ss:$16 sps:$4 sm:$0xff]  }
 0x269   :  { %3367 = vtanh.bf16 %v1195_v6  ;;  %v3290_v6 = vld [vmem:[#allocation8 + $0x348] ss:$16 sps:$4 sm:$0xff]  }
 0x26a   :  { %3369 = vtanh.bf16 %v1194_v55  ;;  %v3354_v55 = vld [vmem:[#allocation10 + $0xb8] sm:$0xff]  }
 0x272   :  { %v3364_v7 = vpop.eup %3363 }
 0x273   :  { %v1200_v8 = vadd.bf16 1065369472, %v3364_v7  ;;  %v3366_v9 = vpop.eup %3365  ;;  %v3295_v7 = vld [vmem:[#allocation8 + $0x364] ss:$16 sps:$4 sm:$0xff]  }
 0x274   :  { %v3368_v10 = vpop.eup %3367  ;;  %v1201_v11 = vadd.bf16 1065369472, %v3366_v9  ;;  %v3293_v9 = vld [vmem:[#allocation8 + $0x360] ss:$16 sps:$4 sm:$0xff]  }
 0x275   :  { %v1204_v12 = vmul.bf16 1056980736, %v1200_v8  ;;  %v1203_v13 = vadd.bf16 1065369472, %v3368_v10  ;;  %v3298_v8 = vld [vmem:[#allocation8 + $0x36c] ss:$16 sps:$4 sm:$0xff]  }
 0x276   :  { %v1205_v14 = vmul.bf16 1056980736, %v1201_v11  ;;  %v3296_v10 = vld [vmem:[#allocation8 + $0x368] ss:$16 sps:$4 sm:$0xff]   ;;  %v3301_v11 = vld [vmem:[#allocation8 + $0x384] ss:$16 sps:$4 sm:$0xff]  }
 0x277   :  { %v1207_v15 = vmul.bf16 1056980736, %v1203_v13  ;;  %v1208_v20 = vmul.bf16 %v1204_v12, %v1188_v63  ;;  %v3283_v63 = vld [vmem:[#allocation8 + $0x324] ss:$16 sps:$4 sm:$0xff]   ;;  %v3304_v12 = vld [vmem:[#allocation8 + $0x38c] ss:$16 sps:$4 sm:$0xff]  }
 0x278   :  { %v1209_v17 = vmul.bf16 %v1205_v14, %v1189_v2  ;;  %v3284_v2 = vld [vmem:[#allocation8 + $0x328] ss:$16 sps:$4 sm:$0xff]   ;;  %v3299_v13 = vld [vmem:[#allocation8 + $0x380] ss:$16 sps:$4 sm:$0xff]  }
 0x279   :  { %v1211_v22 = vmul.bf16 %v1207_v15, %v1191_v3  ;;  %v3289_v3 = vld [vmem:[#allocation8 + $0x344] ss:$16 sps:$4 sm:$0xff]   ;;  %v3302_v14 = vld [vmem:[#allocation8 + $0x388] ss:$16 sps:$4 sm:$0xff]  }
 0x27a   :  { %2034 = vmatprep.mubr.bf16.mxu0 %v1209_v17  ;;  %2116 = vmatprep.mubr.bf16.mxu1 %v1209_v17  ;;  %v3307_v15 = vld [vmem:[#allocation8 + $0x3a4] ss:$16 sps:$4 sm:$0xff]   ;;  %v3310_v17 = vld [vmem:[#allocation8 + $0x3ac] ss:$16 sps:$4 sm:$0xff]  }
 0x27b   :  { %2035 = vmatmul.mubr.bf16.vlgmr.msra.gmra.mrb[8].mxu0 %v1208_v20  ;;  %2117 = vmatmul.mubr.bf16.vlgmr.msra.gmra.mrb[8].mxu1 %v1208_v20  ;;  %v3313_v20 = vld [vmem:[#allocation8 + $0x3c4] ss:$16 sps:$4 sm:$0xff]  }
 0x27c   :  { %2044 = vmatpush1.bf16.msra.mxu0 %v3227_v18  ;;  %2126 = vmatpush1.bf16.msra.mxu1 %v3230_v19  ;;  %v3305_v18 = vld [vmem:[#allocation8 + $0x3a0] ss:$16 sps:$4 sm:$0xff]   ;;  %v3308_v19 = vld [vmem:[#allocation8 + $0x3a8] ss:$16 sps:$4 sm:$0xff]  }
 0x27d   :  { %2075 = vmatprep.mubr.bf16.mxu0 %v1211_v22  ;;  %2157 = vmatprep.mubr.bf16.mxu1 %v1211_v22  ;;  %v3311_v22 = vld [vmem:[#allocation8 + $0x3c0] ss:$16 sps:$4 sm:$0xff]  }
 0x27e   :  { %2045 = vmatprep.subr.bf16.mxu0 %v3235_v21  ;;  %2127 = vmatprep.subr.bf16.mxu1 %v3238_v16  ;;  %v3316_v21 = vld [vmem:[#allocation8 + $0x3cc] ss:$16 sps:$4 sm:$0xff]   ;;  %v3370_v16 = vpop.eup %3369 }
 0x280   :  { %2046 = vmatpush1.bf16.msra.mxu0 %v3233_v23  ;;  %2128 = vmatpush1.bf16.msra.mxu1 %v3236_v24  ;;  %v3314_v23 = vld [vmem:[#allocation8 + $0x3c8] ss:$16 sps:$4 sm:$0xff]   ;;  %v1202_v24 = vadd.bf16 1065369472, %v3370_v16 }
 0x281   :  { %2047 = vmatprep.subr.bf16.mxu0 %v3241_v25  ;;  %2129 = vmatprep.subr.bf16.mxu1 %v3244_v26  ;;  %v3319_v25 = vld [vmem:[#allocation8 + $0x3e4] ss:$16 sps:$4 sm:$0xff]   ;;  %v3322_v26 = vld [vmem:[#allocation8 + $0x3ec] ss:$16 sps:$4 sm:$0xff]  }
 0x284   :  { %2048 = vmatpush1.bf16.msra.mxu0 %v3239_v27  ;;  %2130 = vmatpush1.bf16.msra.mxu1 %v3242_v28  ;;  %v3317_v27 = vld [vmem:[#allocation8 + $0x3e0] ss:$16 sps:$4 sm:$0xff]   ;;  %v3320_v28 = vld [vmem:[#allocation8 + $0x3e8] ss:$16 sps:$4 sm:$0xff]  }
 0x285   :  { %2049 = vmatprep.subr.bf16.mxu0 %v3247_v29  ;;  %2131 = vmatprep.subr.bf16.mxu1 %v3250_v30  ;;  %v1206_v29 = vmul.bf16 1056980736, %v1202_v24  ;;  %v3323_v30 = vld [vmem:[#allocation10 + $0x40] sm:$0xff]  }
 0x288   :  { %2050 = vmatpush1.bf16.msra.mxu0 %v3245_v31  ;;  %2132 = vmatpush1.bf16.msra.mxu1 %v3248_v32  ;;  %v3324_v31 = vld [vmem:[#allocation10 + $0xc0] sm:$0xff]  }
 0x289   :  { %2051 = vmatprep.subr.bf16.mxu0 %v3253_v33  ;;  %2133 = vmatprep.subr.bf16.mxu1 %v3256_v34  ;;  %v3325_v32 = vld [vmem:[#allocation10] sm:$0xff]   ;;  %v1210_v34 = vmul.bf16 %v1206_v29, %v3678_v1  ;;  %v3349_v1 = vld [vmem:[#allocation10 + $0x30] sm:$0xff]  }
 0x28a   :  { %v3326_v33 = vld [vmem:[#allocation10 + $0x80] sm:$0xff]  }
 0x28c   :  { %2052 = vmatpush1.bf16.msra.mxu0 %v3251_v35  ;;  %2134 = vmatpush1.bf16.msra.mxu1 %v3254_v36  ;;  %v3327_v35 = vld [vmem:[#allocation10 + $0x48] sm:$0xff]  }
 0x28d   :  { %2053 = vmatprep.subr.bf16.mxu0 %v3259_v37  ;;  %2135 = vmatprep.subr.bf16.mxu1 %v3262_v38  ;;  %v3328_v36 = vld [vmem:[#allocation10 + $0xc8] sm:$0xff]  }
 0x28e   :  { %v3329_v37 = vld [vmem:[#allocation10 + $0x8] sm:$0xff]  }
 0x28f   :  { %v3330_v38 = vld [vmem:[#allocation10 + $0x88] sm:$0xff]  }
 0x290   :  { %2054 = vmatpush1.bf16.msra.mxu0 %v3257_v39  ;;  %2136 = vmatpush1.bf16.msra.mxu1 %v3260_v40  ;;  %v3331_v39 = vld [vmem:[#allocation10 + $0x50] sm:$0xff]  }
 0x291   :  { %2055 = vmatprep.subr.bf16.mxu0 %v3265_v41  ;;  %2137 = vmatprep.subr.bf16.mxu1 %v3268_v42  ;;  %v3332_v40 = vld [vmem:[#allocation10 + $0xd0] sm:$0xff]  }
 0x292   :  { %v3333_v41 = vld [vmem:[#allocation10 + $0x10] sm:$0xff]  }
 0x293   :  { %v3334_v42 = vld [vmem:[#allocation10 + $0x90] sm:$0xff]  }
 0x294   :  { %2056 = vmatpush1.bf16.msra.mxu0 %v3263_v44  ;;  %2138 = vmatpush1.bf16.msra.mxu1 %v3266_v51  ;;  %v3335_v44 = vld [vmem:[#allocation10 + $0x58] sm:$0xff]  }
 0x295   :  { %2057 = vmatprep.subr.bf16.mxu0 %v3271_v52  ;;  %2139 = vmatprep.subr.bf16.mxu1 %v3274_v53  ;;  %v3336_v51 = vld [vmem:[#allocation10 + $0xd8] sm:$0xff]  }
 0x296   :  { %v3337_v52 = vld [vmem:[#allocation10 + $0x18] sm:$0xff]  }
 0x297   :  { %v3338_v53 = vld [vmem:[#allocation10 + $0x98] sm:$0xff]  }
 0x298   :  { %2058 = vmatpush1.bf16.msra.mxu0 %v3269_v56  ;;  %2140 = vmatpush1.bf16.msra.mxu1 %v3272_v57  ;;  %v3340_v56 = vld [vmem:[#allocation10 + $0xe0] sm:$0xff]  }
 0x299   :  { %2059 = vmatprep.subr.bf16.mxu0 %v3277_v58  ;;  %2141 = vmatprep.subr.bf16.mxu1 %v3280_v59  ;;  %v3341_v57 = vld [vmem:[#allocation10 + $0x20] sm:$0xff]   ;;  %v3343_v59 = vld [vmem:[#allocation10 + $0x68] sm:$0xff]  }
 0x29a   :  { %v3342_v58 = vld [vmem:[#allocation10 + $0xa0] sm:$0xff]  }
 0x29c   :  { %2060 = vmatpush1.bf16.msra.mxu0 %v3275_v61  ;;  %2142 = vmatpush1.bf16.msra.mxu1 %v3278_v62  ;;  %v3345_v61 = vld [vmem:[#allocation10 + $0x28] sm:$0xff]  }
 0x29d   :  { %2061 = vmatprep.subr.bf16.mxu0 %v3283_v63  ;;  %2143 = vmatprep.subr.bf16.mxu1 %v3286_v0  ;;  %v3346_v62 = vld [vmem:[#allocation10 + $0xa8] sm:$0xff]   ;;  %v3347_v63 = vld [vmem:[#allocation10 + $0x70] sm:$0xff]  }
 0x29e   :  { %v3348_v0 = vld [vmem:[#allocation10 + $0xf0] sm:$0xff]  }
 0x2a0   :  { %2062 = vmatpush1.bf16.msra.mxu0 %v3281_v48  ;;  %2144 = vmatpush1.bf16.msra.mxu1 %v3284_v2  ;;  %v3350_v48 = vld [vmem:[#allocation10 + $0xb0] sm:$0xff]   ;;  %v3351_v2 = vld [vmem:[#allocation10 + $0x78] sm:$0xff]  }
 0x2a1   :  { %2063 = vmatprep.subr.bf16.mxu0 %v3289_v3  ;;  %2145 = vmatprep.subr.bf16.mxu1 %v3292_v4  ;;  %v3352_v3 = vld [vmem:[#allocation10 + $0xf8] sm:$0xff]  }
 0x2a2   :  { %v3353_v4 = vld [vmem:[#allocation10 + $0x38] sm:$0xff]  }
 0x2a4   :  { %2064 = vmatpush1.bf16.msra.mxu0 %v3287_v5  ;;  %2146 = vmatpush1.bf16.msra.mxu1 %v3290_v6  ;;  %v1340_v5 = vld [vmem:[%s3714_s5] sm:$0xf] }
 0x2a5   :  { %2065 = vmatprep.subr.bf16.mxu0 %v3295_v7  ;;  %2147 = vmatprep.subr.bf16.mxu1 %v3298_v8  ;;  %v1345_v6 = vrot.slane %v1340_v5, %v366_v47  ;;  %v1353_v7 = vrot.slane %v1340_v5, %v374_v43  ;;  %v1349_v8 = vrot.slane %v1340_v5, %v370_v49 }
 0x2a8   :  { %2066 = vmatpush1.bf16.msra.mxu0 %v3293_v9  ;;  %2148 = vmatpush1.bf16.msra.mxu1 %v3296_v10  ;;  %v1357_v9 = vrot.slane %v1340_v5, %v378_v50 }
 0x2a9   :  { %2067 = vmatprep.subr.bf16.mxu0 %v3301_v11  ;;  %2149 = vmatprep.subr.bf16.mxu1 %v3304_v12 }
 0x2ac   :  { %2068 = vmatpush1.bf16.msra.mxu0 %v3299_v13  ;;  %2150 = vmatpush1.bf16.msra.mxu1 %v3302_v14 }
 0x2ad   :  { %2069 = vmatprep.subr.bf16.mxu0 %v3307_v15  ;;  %2151 = vmatprep.subr.bf16.mxu1 %v3310_v17 }
 0x2b0   :  { %2070 = vmatpush1.bf16.msra.mxu0 %v3305_v18  ;;  %2152 = vmatpush1.bf16.msra.mxu1 %v3308_v19 }
 0x2b1   :  { %2071 = vmatprep.subr.bf16.mxu0 %v3313_v20  ;;  %2153 = vmatprep.subr.bf16.mxu1 %v3316_v21 }
 0x2b4   :  { %2072 = vmatpush1.bf16.msra.mxu0 %v3311_v22  ;;  %2154 = vmatpush1.bf16.msra.mxu1 %v3314_v23 }
 0x2b5   :  { %2073 = vmatprep.subr.bf16.mxu0 %v3319_v25  ;;  %2155 = vmatprep.subr.bf16.mxu1 %v3322_v26 }
 0x2b8   :  { %2074 = vmatpush1.bf16.msra.mxu0 %v3317_v27  ;;  %2156 = vmatpush1.bf16.msra.mxu1 %v3320_v28 }
 0x2b9   :  { %2856 = vmatprep.subr.bf16.mxu0 %v3323_v30  ;;  %2878 = vmatprep.subr.bf16.mxu1 %v3324_v31 }
 0x2bb   :  { %2076 = vmatmul.mubr.bf16.vlgmr.msra.gmra.mrb[8].mxu0 %v1210_v34  ;;  %2158 = vmatmul.mubr.bf16.vlgmr.msra.gmra.mrb[8].mxu1 %v1210_v34 }
 0x2bc   :  { %2857 = vmatpush3.bf16.msra.mxu0 %v3325_v32  ;;  %2879 = vmatpush3.bf16.msra.mxu1 %v3326_v33 }
 0x2bd   :  { %2858 = vmatprep.subr.bf16.mxu0 %v3327_v35  ;;  %2880 = vmatprep.subr.bf16.mxu1 %v3328_v36 }
 0x2c0   :  { %2859 = vmatpush3.bf16.msra.mxu0 %v3329_v37  ;;  %2881 = vmatpush3.bf16.msra.mxu1 %v3330_v38 }
 0x2c1   :  { %2860 = vmatprep.subr.bf16.mxu0 %v3331_v39  ;;  %2882 = vmatprep.subr.bf16.mxu1 %v3332_v40 }
 0x2c4   :  { %2861 = vmatpush3.bf16.msra.mxu0 %v3333_v41  ;;  %2883 = vmatpush3.bf16.msra.mxu1 %v3334_v42 }
 0x2c5   :  { %2862 = vmatprep.subr.bf16.mxu0 %v3335_v44  ;;  %2884 = vmatprep.subr.bf16.mxu1 %v3336_v51  ;;  %v2823_v44 = vld [vmem:[%s3716_s7] ss:$0 sm:$0xff]  ;;  %s3491_s7 = scalar_lea.vmem %s2549_s24, 128 }
 0x2c6   :  { %p3492_p12 = scmp.ne.s32.totalorder %s2549_s24, %s3491_s7  ;;  %p3497_p0 = scmp.lt.s32.totalorder %s3491_s7, %s3491_s7 }
 0x2c8   :  { %2863 = vmatpush3.bf16.msra.mxu0 %v3337_v52  ;;  %2885 = vmatpush3.bf16.msra.mxu1 %v3338_v53  ;;  %p3498_p1 = por %p3497_p0, %p3496_p13 }
 0x2c9   :  { %2864 = vmatprep.subr.bf16.mxu0 %v3339_v54  ;;  %2886 = vmatprep.subr.bf16.mxu1 %v3340_v56 }
 0x2ca   :  { %p3499_p2 = pnand %p3498_p1, %p3492_p12 }
 0x2cc   :  { %2865 = vmatpush3.bf16.msra.mxu0 %v3341_v57  ;;  %2887 = vmatpush3.bf16.msra.mxu1 %v3342_v58 }
 0x2cd   :  { %2866 = vmatprep.subr.bf16.mxu0 %v3343_v59  ;;  %2888 = vmatprep.subr.bf16.mxu1 %v3344_v60 }
 0x2d0   :  { %2867 = vmatpush3.bf16.msra.mxu0 %v3345_v61  ;;  %2889 = vmatpush3.bf16.msra.mxu1 %v3346_v62 }
 0x2d1   :  { %2868 = vmatprep.subr.bf16.mxu0 %v3347_v63  ;;  %2890 = vmatprep.subr.bf16.mxu1 %v3348_v0 }
 0x2d4   :  { %2869 = vmatpush3.bf16.msra.mxu0 %v3349_v1  ;;  %2891 = vmatpush3.bf16.msra.mxu1 %v3350_v48  ;;  %v2538_v1 = vand.u32 127, %v364_v45 }
 0x2d5   :  { %2870 = vmatprep.subr.bf16.mxu0 %v3351_v2  ;;  %2892 = vmatprep.subr.bf16.mxu1 %v3352_v3 }
 0x2d6   :  { %vm2539_vm2 = vcmp.eq.s32.totalorder %v2538_v1, 0 }
 0x2d8   :  { %2871 = vmatpush3.bf16.msra.mxu0 %v3353_v4  ;;  %2893 = vmatpush3.bf16.msra.mxu1 %v3354_v55 }
 0x38e   :  { %v2077_v10 = vpop.f32.mrb[8].mxu0  ;;  %v2159_v11 = vpop.f32.mrb[8].mxu1 }
 0x38f   :  { %v2904_v12 = vadd.f32 %v2077_v10, %v1345_v6  ;;  %v2906_v13 = vadd.f32 %v2159_v11, %v1353_v7  ;;  %v2079_v14 = vpop.f32.mrb[9].mxu0  ;;  %v2161_v15 = vpop.f32.mrb[9].mxu1 }
 0x390   :  { %v2905_v17 = vadd.f32 %v2079_v14, %v1349_v8  ;;  %v2907_v18 = vadd.f32 %v2161_v15, %v1357_v9  ;;  %v2081_v19 = vpop.f32.mrb[10].mxu0  ;;  %v2163_v20 = vpop.f32.mrb[10].mxu1 }
 0x391   :  { %v2166_v47 = vpack.c.bf16 %v2904_v12, %v2904_v12  ;;  %v2168_v21 = vpack.c.bf16 %v2906_v13, %v2906_v13  ;;  %v2082_v16 = vpop.f32.mrb[11].mxu0  ;;  %v2164_v43 = vpop.f32.mrb[11].mxu1 }
 0x392   :  { %v2167_v22 = vpack.c.bf16 %v2905_v17, %v2905_v17  ;;  %v2169_v23 = vpack.c.bf16 %v2907_v18, %v2907_v18 }
 0x393   :  { %v2170_v49 = vmul.bf16 1056980736, %v2166_v47  ;;  %v2172_v24 = vmul.bf16 1056980736, %v2168_v21 }
 0x394   :  { %v2171_v46 = vmul.bf16 1056980736, %v2167_v22  ;;  %v2173_v50 = vmul.bf16 1056980736, %v2169_v23 }
 0x395   :  { %3371 = vtanh.bf16 %v2170_v49 }
 0x396   :  { %3373 = vtanh.bf16 %v2172_v24 }
 0x397   :  { %3375 = vtanh.bf16 %v2171_v46 }
 0x398   :  { %3377 = vtanh.bf16 %v2173_v50 }
 0x3a0   :  { %v3372_v25 = vpop.eup %3371 }
 0x3a1   :  { %v3374_v26 = vpop.eup %3373  ;;  %v2178_v27 = vadd.bf16 1065369472, %v3372_v25 }
 0x3a2   :  { %v3376_v28 = vpop.eup %3375  ;;  %v2180_v29 = vadd.bf16 1065369472, %v3374_v26 }
 0x3a3   :  { %v3378_v30 = vpop.eup %3377  ;;  %v2179_v31 = vadd.bf16 1065369472, %v3376_v28  ;;  %v2182_v32 = vmul.bf16 1056980736, %v2178_v27 }
 0x3a4   :  { %v2181_v33 = vadd.bf16 1065369472, %v3378_v30  ;;  %v2184_v34 = vmul.bf16 1056980736, %v2180_v29 }
 0x3a5   :  { %v2183_v35 = vmul.bf16 1056980736, %v2179_v31  ;;  %v2186_v38 = vmul.bf16 %v2182_v32, %v2166_v47 }
 0x3a6   :  { %v2185_v36 = vmul.bf16 1056980736, %v2181_v33  ;;  %v2188_v40 = vmul.bf16 %v2184_v34, %v2168_v21 }
 0x3a7   :  { %v2187_v37 = vmul.bf16 %v2183_v35, %v2167_v22 }
 0x3a8   :  { %v2189_v39 = vmul.bf16 %v2185_v36, %v2169_v23 }
 0x3a9   :  { %2485 = vmatprep.mubr.bf16.mxu0 %v2187_v37 }
 0x3aa   :  { %2525 = vmatprep.mubr.bf16.mxu1 %v2189_v39  ;;  %2486 = vmatmul.mubr.bf16.vlgmr.msra.gmra.mrb[12].mxu0 %v2186_v38 }
 0x3ab   :  { %2526 = vmatmul.mubr.bf16.vlgmr.msra.gmra.mrb[12].mxu1 %v2188_v40 }
 0x47d   :  { %v2872_v41 = vpop.f32.mrb[12].mxu0 }
 0x47e   :  { %v2894_v42 = vpop.f32.mrb[12].mxu1  ;;  %v2873_v51 = vpop.f32.mrb[13].mxu0 }
 0x47f   :  { %v2874_v52 = vadd.f32 %v2873_v51, %v2872_v41  ;;  %v2895_v53 = vpop.f32.mrb[13].mxu1  ;;  %v2875_v54 = vpop.f32.mrb[14].mxu0 }
 0x480   :  { %v2896_v56 = vadd.f32 %v2895_v53, %v2894_v42  ;;  %v2897_v57 = vpop.f32.mrb[14].mxu1  ;;  %v2876_v58 = vpop.f32.mrb[15].mxu0 }
 0x481   :  { %v2488_v59 = vadd.f32 %v2874_v52, %v2823_v44  ;;  %v2898_v60 = vpop.f32.mrb[15].mxu1 }
 0x483   :  { %v2528_v61 = vadd.f32 %v2896_v56, %v2488_v59 }
 0x485   :  { %v2533_v62 = vmax.f32 %v2528_v61, -20.0 }
 0x487   :  { %v2534_v63 = vmin.f32 %v2533_v62, 2.0 }
 0x489   :  { %v2535_v0 = vmul.f32 1.442695, %v2534_v63 }
 0x48b   :  { %3379 = vpow2.f32 %v2535_v0 }
 0x495   :  { %v3380_v48 = vpop.eup %3379 }
 0x496   :  { %v2540_v2 = vsel %vm2539_vm2, %v2528_v61, %v3380_v48 }
 0x497   :  { %2541 = vst [vmem:[#allocation11] sm:$0xff] %v2540_v2 }
 0x498   :  { %3502 = shalt.err (!%p3499_p2)
}
 0x499   :  { %s3503_s27 = scalar_lea.hbm %s3717_s8, 128 }
 0x49a   :  { %p3504_p3 = scmp.ne.s32.totalorder %s3717_s8, %s3503_s27  ;;  %p3507_p4 = scmp.lt.u32.totalorder %s3503_s27, %s3717_s8 }
 0x49c   :  { %p3509_p5 = pnand %p3507_p4, %p3504_p3 }
 0x49e   :  { %3512 = shalt.err (!%p3509_p5)
}
 0x49f   :  { %2551 = dma.vmem_to_hbm [thread:$0]  %s2549_s24, 128, %s3717_s8, [#allocation4]  }
 0x4a0   :  { %3519 = dma.done.wait [#allocation4], 128  }
 0x4a1   :  { %3520 = vsyncadd [#allocation4], 4294967168 }
 0x4a2   :  { %2555 = vsyncpa [#allocation3], 1 }
 0x4a3   :  { %2556 = vsyncpa [#allocation6], 1 }
 0x4a4   :  { %2557 = vsyncpa [#allocation9], 1 }
 0x4a5   :  { %2558 = vsyncpa [#allocation4], 1 }

</bundles_post_ra>
